<compile_context>
chip_gen: v7x
topology: tpu7x:2x2x1
jax: 0.10.0
libtpu: 0.0.40
codegen_flags: <defaults>
</compile_context>

<pallas_src>
import functools

import numpy as np
import jax
import jax.numpy as jnp
from jax.experimental import pallas as pl
from jax.experimental.pallas import tpu as pltpu

# ---------------- problem sizes (small, consistent with CAEDecoder) ----------
BATCH = 2
WIDTH = HEIGHT = 16
CHANNELS = 3
HID_DIM = 32
CODE_DIM = 16
FIRST_FEAT = 4                         # first_feature_count
L1 = FIRST_FEAT                        # self.l1_feat
L2 = 2 * FIRST_FEAT                    # self.l2_feat
HC = HEIGHT // 4                       # h_conv_dim (4)
WC = WIDTH // 4                        # w_conv_dim (4)
S1 = HC * WC                           # pooled spatial, level 1 (16)
H1IMG, W1IMG = 2 * HC, 2 * WC          # level-1 image (8, 8)
P1HW = H1IMG * W1IMG                   # 64
H2IMG, W2IMG = HEIGHT, WIDTH           # level-2 image (16, 16)
P2HW = H2IMG * W2IMG                   # 256
CONV_DIM = S1 * L2                     # 128
ROWS1 = L2 * BATCH                     # 16 activation rows at level-1 resolution
ROWS2 = L1 * BATCH                     # 8  activation rows at level-2 resolution
OUT_ROWS = ((CHANNELS * BATCH + 7) // 8) * 8   # output rows padded to a full sublane tile
PAD1 = 32                              # zero pad (lanes) for level-1 shift reads -> (16,128) scratch
PAD2 = 64                              # zero pad (lanes) for level-2 shift reads -> (8,384) scratch
# Tap order must match the host-side weight packing loop (ky, kx) with (dy,dx)=(ky-1,kx-1).
TAPS = [(dy, dx) for dy in (-1, 0, 1) for dx in (-1, 0, 1)]


# ---------------- small in-kernel integer helpers (divisors are powers of 2) --
def _div_p2(x, d):
    return x >> (d.bit_length() - 1)


def _mod_p2(x, d):
    return x & (d - 1)


def _border_masks(rows, h, w):
    """Hoisted per-resolution boundary masks: one f32 0/1 mask per off-center tap.
    Built once per spatial resolution and reused by BOTH conv layers there."""
    hw = h * w
    q = jax.lax.broadcasted_iota(jnp.int32, (rows, hw), 1)
    yq = _div_p2(q, w)
    xq = _mod_p2(q, w)
    masks = []
    for dy, dx in TAPS:
        cond = None
        if dy == -1:
            cond = yq >= 1
        elif dy == 1:
            cond = yq <= h - 2
        if dx == -1:
            c = xq >= 1
            cond = c if cond is None else jnp.logical_and(cond, c)
        elif dx == 1:
            c = xq <= w - 2
            cond = c if cond is None else jnp.logical_and(cond, c)
        masks.append(None if cond is None else cond.astype(jnp.float32))
    return masks


# ---------------- fused Pallas kernel -----------------------------------------
def _cae_fused_kernel(x_ref, w1_ref, b1_ref, w2_ref, b2_ref,
                      u1_ref, u2_ref, m1_ref, m2_ref,
                      a1a_ref, a1b_ref, a2a_ref, a2b_ref,
                      o_ref,
                      h2_scr, feat_scr, pad1_scr, pad2_scr, tap1_scr, tap2_scr):
    f32 = jnp.float32
    bf16 = jnp.bfloat16

    # ---------------- MLP: relu(layer2(relu(layer1(x)))) ----------------------
    # (2,16)x(16,32) and (2,32)x(32,128): negligible MXU work -> kept in f32 to
    # keep the trunk accurate; bf16 is applied to the larger conv/unpool matmuls.
    h = jnp.dot(x_ref[...], w1_ref[...], preferred_element_type=f32) + b1_ref[...]
    h = jnp.maximum(h, 0.0)
    h = jnp.dot(h, w2_ref[...], preferred_element_type=f32) + b2_ref[...]
    h2 = jnp.maximum(h, 0.0)                                    # (B, CONV_DIM)

    # ---------------- relayout (B, L2*S1) -> (L2*B, S1), channel-major rows ----
    # feat[c*B+b, s] = h2[b, c*S1+s].  8 static row-block copies through a tiny
    # VMEM scratch (no permutation matmuls, no iota/where builds).
    h2_scr[...] = h2
    for c in range(L2):
        feat_scr[pl.ds(c * BATCH, BATCH), :] = h2_scr[:, pl.ds(c * S1, S1)]
    feat = feat_scr[...]                                        # (ROWS1, S1)

    # ---------------- one-time scratch init ------------------------------------
    # Zero the shift-pad scratches once: the border lanes stay zero forever (only
    # the middle window is ever rewritten), so out-of-image tap reads are exact 0
    # (never uninitialized VMEM garbage/NaN).
    pad1_scr[...] = jnp.zeros(pad1_scr.shape, f32)
    pad2_scr[...] = jnp.zeros(pad2_scr.shape, f32)
    # Ones (bias) tap block: written once per resolution, reused by both convs.
    tap1_scr[pl.ds(9 * ROWS1, ROWS1), :] = jnp.ones((ROWS1, P1HW), f32)
    tap2_scr[pl.ds(9 * ROWS2, ROWS2), :] = jnp.ones((ROWS2, P2HW), f32)

    # Hoisted per-resolution boundary masks (built once, reused by both convs).
    masks1 = _border_masks(ROWS1, H1IMG, W1IMG)
    masks2 = _border_masks(ROWS2, H2IMG, W2IMG)

    # ---------------- MaxUnpool2d(2, stride=2) ---------------------------------
    def unpool(vals, u_ref, m_ref):
        # Upsample with the small cached parent-copy matrix, then apply the
        # scatter mask precomputed from the encoder indices in the wrapper.
        up = jnp.dot(vals.astype(bf16), u_ref[...], preferred_element_type=f32)
        return up * m_ref[...]

    # ---------------- 3x3 same-pad conv (== ConvTranspose2d(k=3,s=1,p=1)) ------
    def conv3x3(xact, a_ref, masks, pad_scr, tap_scr, w, pad):
        # Write the activation into the middle of the zero-padded scratch; each of
        # the 9 taps is an offset lane-window read (tap[:, q] = x[:, q+d], zero /
        # masked at image borders).  Taps + the ones(bias) block form the stacked
        # im2col operand in tap_scr, consumed by ONE bf16 channel-mixing matmul.
        rows, hw = xact.shape
        pad_scr[:, pl.ds(pad, hw)] = xact
        for t, (dy, dx) in enumerate(TAPS):
            d = dy * w + dx
            tap = xact if d == 0 else pad_scr[:, pl.ds(pad + d, hw)]
            m = masks[t]
            if m is not None:
                tap = tap * m
            tap_scr[pl.ds(t * rows, rows), :] = tap
        stacked = tap_scr[...].astype(bf16)                     # (10*rows, hw)
        return jnp.dot(a_ref[...], stacked, preferred_element_type=f32)

    # ---------------- decoder pipeline ------------------------------------------
    x1 = unpool(feat, u1_ref, m1_ref)                                         # (16, 64)
    x1 = jnp.maximum(conv3x3(x1, a1a_ref, masks1, pad1_scr, tap1_scr, W1IMG, PAD1), 0.0)
    x1 = jnp.maximum(conv3x3(x1, a1b_ref, masks1, pad1_scr, tap1_scr, W1IMG, PAD1), 0.0)  # (8, 64)
    x2 = unpool(x1, u2_ref, m2_ref)                                           # (8, 256)
    x2 = jnp.maximum(conv3x3(x2, a2a_ref, masks2, pad2_scr, tap2_scr, W2IMG, PAD2), 0.0)
    y = conv3x3(x2, a2b_ref, masks2, pad2_scr, tap2_scr, W2IMG, PAD2)         # (OUT_ROWS, 256)
    o_ref[...] = jnp.tanh(y)


# ---------------- one-time host-side parameter packing (cached) ---------------
@functools.lru_cache(maxsize=None)
def _unpool_mat(hc, wc):
    """U of shape (hc*wc, 4*hc*wc): (x2d @ U)[:, q] = x2d[:, parent(q)]."""
    h2, w2 = 2 * hc, 2 * wc
    u = np.zeros((hc * wc, h2 * w2), np.float32)
    for qy in range(h2):
        for qx in range(w2):
            u[(qy // 2) * wc + qx // 2, qy * w2 + qx] = 1.0
    return jnp.asarray(u)


def _conv_cat_weight(wt, bias, batch, pad_rows=None):
    """ConvTranspose2d(s=1,p=1) weight (I,O,3,3) + bias -> folded im2col weight of shape
    (O*B [optionally padded], 10*I*B): 9 channel-mixing blocks kron(Wc[:,:,ky,kx], I_B)
    (channel-major rows c*B+b) followed by a bias block feeding the ones tap.  bf16."""
    wt = np.asarray(wt, np.float32)
    bias = np.asarray(bias, np.float32)
    wc = np.transpose(wt, (1, 0, 2, 3))[:, :, ::-1, ::-1]       # equivalent conv (O,I,3,3)
    o_ch, i_ch = wc.shape[0], wc.shape[1]
    eye = np.eye(batch, dtype=np.float32)
    blocks = [np.kron(np.ascontiguousarray(wc[:, :, ky, kx]), eye)
              for ky in range(3) for kx in range(3)]
    bias_blk = np.zeros((o_ch * batch, i_ch * batch), np.float32)
    bias_blk[:, 0] = np.repeat(bias, batch)
    blocks.append(bias_blk)
    a = np.concatenate(blocks, axis=1)
    if pad_rows is not None and a.shape[0] < pad_rows:
        a = np.concatenate(
            [a, np.zeros((pad_rows - a.shape[0], a.shape[1]), np.float32)], axis=0)
    return jnp.asarray(a).astype(jnp.bfloat16)


def prepare_decoder_params(params, batch=BATCH):
    """Pack the decoder parameters for the fused kernel (called once).  MXU-only
    operands (conv weights, unpool matrices) are stored in bf16; MLP stays f32."""
    return {
        "W1": jnp.asarray(params["W1"], jnp.float32),
        "b1": jnp.asarray(params["b1"], jnp.float32)[None, :],
        "W2": jnp.asarray(params["W2"], jnp.float32),
        "b2": jnp.asarray(params["b2"], jnp.float32)[None, :],
        "U1": _unpool_mat(HC, WC).astype(jnp.bfloat16),
        "U2": _unpool_mat(2 * HC, 2 * WC).astype(jnp.bfloat16),
        "A1a": _conv_cat_weight(params["Wt1a"], params["bt1a"], batch),
        "A1b": _conv_cat_weight(params["Wt1b"], params["bt1b"], batch),
        "A2a": _conv_cat_weight(params["Wt2a"], params["bt2a"], batch),
        "A2b": _conv_cat_weight(params["Wt2b"], params["bt2b"], batch,
                                pad_rows=OUT_ROWS),
    }


# ---------------- wrapper ------------------------------------------------------
def _full_spec(shape):
    nd = len(shape)
    return pl.BlockSpec(shape, lambda i, _nd=nd: (0,) * _nd)


def _scatter_mask(idx_cb, hc, wc):
    """mask[r, q] = 1.0 iff MaxUnpool2d(2,2) places the pooled value of window
    parent(q) at output position q (i.e. idx_cb[r, parent(q)] == q)."""
    h2, w2 = 2 * hc, 2 * wc
    q = jnp.arange(h2 * w2, dtype=jnp.int32)
    parent = (q // w2 // 2) * wc + (q % w2) // 2
    up_idx = jnp.take(idx_cb, parent, axis=1)
    return (up_idx == q[None, :]).astype(jnp.float32)


@jax.jit
def cae_decoder_forward(prepped, x, idx1, idx2):
    """x: (B, CODE_DIM); idx1 == encoder.indices[-1]: (B, L2, HC, WC) int32;
    idx2 == encoder.indices[-2]: (B, L1, 2HC, 2WC) int32.  Returns NCHW output."""
    b = x.shape[0]
    # Channel-major 2-D layouts matching the kernel's (c*B + b) row ordering, and
    # the unpool scatter masks (data-dependent work done by XLA outside the kernel).
    idx1_cb = idx1.transpose(1, 0, 2, 3).reshape(L2 * b, S1)
    idx2_cb = idx2.transpose(1, 0, 2, 3).reshape(L1 * b, P1HW)
    m1 = _scatter_mask(idx1_cb, HC, WC)                 # (L2*B, 64)  f32
    m2 = _scatter_mask(idx2_cb, 2 * HC, 2 * WC)         # (L1*B, 256) f32

    args = (x.astype(jnp.float32), prepped["W1"], prepped["b1"], prepped["W2"],
            prepped["b2"], prepped["U1"], prepped["U2"], m1, m2,
            prepped["A1a"], prepped["A1b"], prepped["A2a"], prepped["A2b"])
    out_shape = (OUT_ROWS, HEIGHT * WIDTH)
    out2d = pl.pallas_call(
        _cae_fused_kernel,
        out_shape=jax.ShapeDtypeStruct(out_shape, jnp.float32),
        grid=(1,),
        in_specs=[_full_spec(a.shape) for a in args],
        out_specs=_full_spec(out_shape),
        scratch_shapes=[
            pltpu.VMEM((BATCH, CONV_DIM), jnp.float32),            # MLP output
            pltpu.VMEM((ROWS1, S1), jnp.float32),                  # relayout target
            pltpu.VMEM((ROWS1, P1HW + 2 * PAD1), jnp.float32),     # level-1 shift pad
            pltpu.VMEM((ROWS2, P2HW + 2 * PAD2), jnp.float32),     # level-2 shift pad
            pltpu.VMEM((10 * ROWS1, P1HW), jnp.float32),           # level-1 stacked taps
            pltpu.VMEM((10 * ROWS2, P2HW), jnp.float32),           # level-2 stacked taps
        ],
        compiler_params=pltpu.CompilerParams(dimension_semantics=("arbitrary",)),
    )(*args)
    out2d = out2d[:CHANNELS * b]                        # drop sublane padding rows
    return out2d.reshape(CHANNELS, b, HEIGHT, WIDTH).transpose(1, 0, 2, 3)


# ---------------- parameters & pure-JAX reference ------------------------------
def init_params(key):
    ks = jax.random.split(key, 12)

    def w(k, shape, scale=0.2):
        return scale * jax.random.normal(k, shape, jnp.float32)

    return {
        "W1": w(ks[0], (CODE_DIM, HID_DIM)),       "b1": w(ks[1], (HID_DIM,), 0.1),
        "W2": w(ks[2], (HID_DIM, CONV_DIM)),       "b2": w(ks[3], (CONV_DIM,), 0.1),
        # ConvTranspose2d weights, PyTorch layout (in_ch, out_ch, kH, kW)
        "Wt1a": w(ks[4], (L2, L2, 3, 3)),          "bt1a": w(ks[5], (L2,), 0.1),
        "Wt1b": w(ks[6], (L2, L1, 3, 3)),          "bt1b": w(ks[7], (L1,), 0.1),
        "Wt2a": w(ks[8], (L1, L1, 3, 3)),          "bt2a": w(ks[9], (L1,), 0.1),
        "Wt2b": w(ks[10], (L1, CHANNELS, 3, 3)),   "bt2b": w(ks[11], (CHANNELS,), 0.1),
    }


def _flip_tconv(wt):
    """ConvTranspose2d(stride=1,pad=1) weight (I,O,k,k) -> equivalent Conv2d weight."""
    return jnp.transpose(wt, (1, 0, 2, 3))[:, :, ::-1, ::-1]


def _unpool_ref(x, idx):
    b, c, h, w = x.shape
    out = jnp.zeros((b, c, 4 * h * w), x.dtype)
    bb = jnp.arange(b)[:, None, None, None]
    cc = jnp.arange(c)[None, :, None, None]
    out = out.at[bb, cc, idx].set(x)
    return out.reshape(b, c, 2 * h, 2 * w)


def _conv_ref(x, wcv, bias):
    y = jax.lax.conv_general_dilated(
        x, wcv, window_strides=(1, 1), padding=((1, 1), (1, 1)),
        dimension_numbers=("NCHW", "OIHW", "NCHW"))
    return y + bias[None, :, None, None]


def reference_forward(x, params, idx1, idx2):
    b = x.shape[0]
    h1 = jax.nn.relu(x @ params["W1"] + params["b1"])
    h2 = jax.nn.relu(h1 @ params["W2"] + params["b2"])
    out = h2.reshape(b, L2, HC, WC)
    out = _unpool_ref(out, idx1)
    out = jax.nn.relu(_conv_ref(out, _flip_tconv(params["Wt1a"]), params["bt1a"]))
    out = jax.nn.relu(_conv_ref(out, _flip_tconv(params["Wt1b"]), params["bt1b"]))
    out = _unpool_ref(out, idx2)
    out = jax.nn.relu(_conv_ref(out, _flip_tconv(params["Wt2a"]), params["bt2a"]))
    out = jnp.tanh(_conv_ref(out, _flip_tconv(params["Wt2b"]), params["bt2b"]))
    return out


# ---------------- driver -------------------------------------------------------
if __name__ == "__main__":
    key = jax.random.PRNGKey(0)
    k_par, k_x, k_i1, k_i2 = jax.random.split(key, 4)
    params = init_params(k_par)
    x = jax.random.normal(k_x, (BATCH, CODE_DIM), jnp.float32)

    # Synthetic encoder pooling indices (window-confined, exactly what
    # MaxPool2d(2, stride=2, return_indices=True) would emit).
    # TODO(synk): the encoder itself is not part of this module; its indices are inputs here.
    def make_pool_indices(k, b, c, hp, wp):
        w2 = 2 * wp
        rh = jax.random.randint(k, (b, c, hp, wp), 0, 2)
        rw = jax.random.randint(jax.random.fold_in(k, 1), (b, c, hp, wp), 0, 2)
        hh = jnp.arange(hp)[None, None, :, None]
        ww = jnp.arange(wp)[None, None, None, :]
        return ((2 * hh + rh) * w2 + (2 * ww + rw)).astype(jnp.int32)

    idx1 = make_pool_indices(k_i1, BATCH, L2, HC, WC)           # encoder.indices[-1]
    idx2 = make_pool_indices(k_i2, BATCH, L1, 2 * HC, 2 * WC)   # encoder.indices[-2]

    prepped = prepare_decoder_params(params)                    # one-time host packing

    out = jax.block_until_ready(cae_decoder_forward(prepped, x, idx1, idx2))
    assert out.shape == (BATCH, CHANNELS, HEIGHT, WIDTH)

    ref = jax.block_until_ready(reference_forward(x, params, idx1, idx2))
    # bf16 MXU operands (per the perf review) with f32 accumulation -> slightly looser
    # tolerance than the pure-f32 version.
    np.testing.assert_allclose(np.asarray(out), np.asarray(ref), rtol=4e-2, atol=4e-2)

    print("KERNEL_OK")
</pallas_src>

<mosaic_0001>
module attributes {stable_mosaic.version = 11 : i64} {
  func.func @_cae_fused_kernel(%arg0: i32, %arg1: memref<2x16xf32, #tpu.memory_space<vmem>>, %arg2: memref<16x32xf32, #tpu.memory_space<vmem>>, %arg3: memref<1x32xf32, #tpu.memory_space<vmem>>, %arg4: memref<32x128xf32, #tpu.memory_space<vmem>>, %arg5: memref<1x128xf32, #tpu.memory_space<vmem>>, %arg6: memref<16x64xbf16, #tpu.memory_space<vmem>>, %arg7: memref<64x256xbf16, #tpu.memory_space<vmem>>, %arg8: memref<16x64xf32, #tpu.memory_space<vmem>>, %arg9: memref<8x256xf32, #tpu.memory_space<vmem>>, %arg10: memref<16x160xbf16, #tpu.memory_space<vmem>>, %arg11: memref<8x160xbf16, #tpu.memory_space<vmem>>, %arg12: memref<8x80xbf16, #tpu.memory_space<vmem>>, %arg13: memref<8x80xbf16, #tpu.memory_space<vmem>>, %arg14: memref<8x256xf32, #tpu.memory_space<vmem>>, %arg15: memref<2x128xf32, #tpu.memory_space<vmem>>, %arg16: memref<16x16xf32, #tpu.memory_space<vmem>>, %arg17: memref<16x128xf32, #tpu.memory_space<vmem>>, %arg18: memref<8x384xf32, #tpu.memory_space<vmem>>, %arg19: memref<160x64xf32, #tpu.memory_space<vmem>>, %arg20: memref<80x256xf32, #tpu.memory_space<vmem>>) attributes {dimension_semantics = [#tpu.dimension_semantics<arbitrary>], iteration_bounds = array<i64: 1>, scalar_prefetch = 0 : i64, scratch_operands = 6 : i64, tpu.core_type = #tpu.core_type<tc>, window_params = [{pipeline_mode = #tpu.pipeline_mode<synchronous>, transform_indices = @transform_0, window_bounds = array<i64: 2, 16>}, {pipeline_mode = #tpu.pipeline_mode<synchronous>, transform_indices = @transform_1, window_bounds = array<i64: 16, 32>}, {pipeline_mode = #tpu.pipeline_mode<synchronous>, transform_indices = @transform_2, window_bounds = array<i64: 1, 32>}, {pipeline_mode = #tpu.pipeline_mode<synchronous>, transform_indices = @transform_3, window_bounds = array<i64: 32, 128>}, {pipeline_mode = #tpu.pipeline_mode<synchronous>, transform_indices = @transform_4, window_bounds = array<i64: 1, 128>}, {pipeline_mode = #tpu.pipeline_mode<synchronous>, transform_indices = @transform_5, window_bounds = array<i64: 16, 64>}, {pipeline_mode = #tpu.pipeline_mode<synchronous>, transform_indices = @transform_6, window_bounds = array<i64: 64, 256>}, {pipeline_mode = #tpu.pipeline_mode<synchronous>, transform_indices = @transform_7, window_bounds = array<i64: 16, 64>}, {pipeline_mode = #tpu.pipeline_mode<synchronous>, transform_indices = @transform_8, window_bounds = array<i64: 8, 256>}, {pipeline_mode = #tpu.pipeline_mode<synchronous>, transform_indices = @transform_9, window_bounds = array<i64: 16, 160>}, {pipeline_mode = #tpu.pipeline_mode<synchronous>, transform_indices = @transform_10, window_bounds = array<i64: 8, 160>}, {pipeline_mode = #tpu.pipeline_mode<synchronous>, transform_indices = @transform_11, window_bounds = array<i64: 8, 80>}, {pipeline_mode = #tpu.pipeline_mode<synchronous>, transform_indices = @transform_12, window_bounds = array<i64: 8, 80>}, {pipeline_mode = #tpu.pipeline_mode<synchronous>, transform_indices = @transform_13, window_bounds = array<i64: 8, 256>}]} {
    %c0 = arith.constant 0 : index
    %c0_0 = arith.constant 0 : index
    %0 = vector.load %arg1[%c0, %c0_0] : memref<2x16xf32, #tpu.memory_space<vmem>>, vector<2x16xf32>
    %c0_1 = arith.constant 0 : index
    %c0_2 = arith.constant 0 : index
    %1 = vector.load %arg2[%c0_1, %c0_2] : memref<16x32xf32, #tpu.memory_space<vmem>>, vector<16x32xf32>
    %cst = arith.constant dense<0.000000e+00> : vector<2x32xf32>
    %2 = tpu.matmul %0, %1, %cst {dimension_numbers = #tpu.dot_dimension_numbers<[1], [0], [0], [1], [0, 0, 1, 1], [], []>} : vector<2x16xf32>, vector<16x32xf32>, vector<2x32xf32> -> vector<2x32xf32>
    %c0_3 = arith.constant 0 : index
    %c0_4 = arith.constant 0 : index
    %3 = vector.load %arg3[%c0_3, %c0_4] : memref<1x32xf32, #tpu.memory_space<vmem>>, vector<1x32xf32>
    %4 = vector.broadcast %3 : vector<1x32xf32> to vector<2x32xf32>
    %5 = arith.addf %2, %4 : vector<2x32xf32>
    %cst_5 = arith.constant 0.000000e+00 : f32
    %6 = vector.broadcast %cst_5 : f32 to vector<2x32xf32>
    %7 = arith.maximumf %5, %6 : vector<2x32xf32>
    %c0_6 = arith.constant 0 : index
    %c0_7 = arith.constant 0 : index
    %8 = vector.load %arg4[%c0_6, %c0_7] : memref<32x128xf32, #tpu.memory_space<vmem>>, vector<32x128xf32>
    %cst_8 = arith.constant dense<0.000000e+00> : vector<2x128xf32>
    %9 = tpu.matmul %7, %8, %cst_8 {dimension_numbers = #tpu.dot_dimension_numbers<[1], [0], [0], [1], [0, 0, 1, 1], [], []>} : vector<2x32xf32>, vector<32x128xf32>, vector<2x128xf32> -> vector<2x128xf32>
    %c0_9 = arith.constant 0 : index
    %c0_10 = arith.constant 0 : index
    %10 = vector.load %arg5[%c0_9, %c0_10] : memref<1x128xf32, #tpu.memory_space<vmem>>, vector<1x128xf32>
    %11 = vector.broadcast %10 : vector<1x128xf32> to vector<2x128xf32>
    %12 = arith.addf %9, %11 : vector<2x128xf32>
    %cst_11 = arith.constant 0.000000e+00 : f32
    %13 = vector.broadcast %cst_11 : f32 to vector<2x128xf32>
    %14 = arith.maximumf %12, %13 : vector<2x128xf32>
    %c0_12 = arith.constant 0 : index
    %c0_13 = arith.constant 0 : index
    %15 = vector.load %arg15[%c0_12, %c0_13] : memref<2x128xf32, #tpu.memory_space<vmem>>, vector<2x128xf32>
    tpu.vector_store %arg15[%c0_12, %c0_13], %14 {strides = array<i32>} : memref<2x128xf32, #tpu.memory_space<vmem>>, vector<2x128xf32>,
    %c0_14 = arith.constant 0 : index
    %c0_15 = arith.constant 0 : index
    %16 = vector.load %arg15[%c0_14, %c0_15] : memref<2x128xf32, #tpu.memory_space<vmem>>, vector<2x16xf32>
    %c0_16 = arith.constant 0 : index
    %c0_17 = arith.constant 0 : index
    %17 = vector.load %arg16[%c0_16, %c0_17] : memref<16x16xf32, #tpu.memory_space<vmem>>, vector<2x16xf32>
    tpu.vector_store %arg16[%c0_16, %c0_17], %16 {strides = array<i32>} : memref<16x16xf32, #tpu.memory_space<vmem>>, vector<2x16xf32>,
    %c0_18 = arith.constant 0 : index
    %c16 = arith.constant 16 : index
    %18 = vector.load %arg15[%c0_18, %c16] : memref<2x128xf32, #tpu.memory_space<vmem>>, vector<2x16xf32>
    %c2 = arith.constant 2 : index
    %c0_19 = arith.constant 0 : index
    %19 = vector.load %arg16[%c2, %c0_19] : memref<16x16xf32, #tpu.memory_space<vmem>>, vector<2x16xf32>
    tpu.vector_store %arg16[%c2, %c0_19], %18 {strides = array<i32>} : memref<16x16xf32, #tpu.memory_space<vmem>>, vector<2x16xf32>,
    %c0_20 = arith.constant 0 : index
    %c32 = arith.constant 32 : index
    %20 = vector.load %arg15[%c0_20, %c32] : memref<2x128xf32, #tpu.memory_space<vmem>>, vector<2x16xf32>
    %c4 = arith.constant 4 : index
    %c0_21 = arith.constant 0 : index
    %21 = vector.load %arg16[%c4, %c0_21] : memref<16x16xf32, #tpu.memory_space<vmem>>, vector<2x16xf32>
    tpu.vector_store %arg16[%c4, %c0_21], %20 {strides = array<i32>} : memref<16x16xf32, #tpu.memory_space<vmem>>, vector<2x16xf32>,
    %c0_22 = arith.constant 0 : index
    %c48 = arith.constant 48 : index
    %22 = vector.load %arg15[%c0_22, %c48] : memref<2x128xf32, #tpu.memory_space<vmem>>, vector<2x16xf32>
    %c6 = arith.constant 6 : index
    %c0_23 = arith.constant 0 : index
    %23 = vector.load %arg16[%c6, %c0_23] : memref<16x16xf32, #tpu.memory_space<vmem>>, vector<2x16xf32>
    tpu.vector_store %arg16[%c6, %c0_23], %22 {strides = array<i32>} : memref<16x16xf32, #tpu.memory_space<vmem>>, vector<2x16xf32>,
    %c0_24 = arith.constant 0 : index
    %c64 = arith.constant 64 : index
    %24 = vector.load %arg15[%c0_24, %c64] : memref<2x128xf32, #tpu.memory_space<vmem>>, vector<2x16xf32>
    %c8 = arith.constant 8 : index
    %c0_25 = arith.constant 0 : index
    %25 = vector.load %arg16[%c8, %c0_25] : memref<16x16xf32, #tpu.memory_space<vmem>>, vector<2x16xf32>
    tpu.vector_store %arg16[%c8, %c0_25], %24 {strides = array<i32>} : memref<16x16xf32, #tpu.memory_space<vmem>>, vector<2x16xf32>,
    %c0_26 = arith.constant 0 : index
    %c80 = arith.constant 80 : index
    %26 = vector.load %arg15[%c0_26, %c80] : memref<2x128xf32, #tpu.memory_space<vmem>>, vector<2x16xf32>
    %c10 = arith.constant 10 : index
    %c0_27 = arith.constant 0 : index
    %27 = vector.load %arg16[%c10, %c0_27] : memref<16x16xf32, #tpu.memory_space<vmem>>, vector<2x16xf32>
    tpu.vector_store %arg16[%c10, %c0_27], %26 {strides = array<i32>} : memref<16x16xf32, #tpu.memory_space<vmem>>, vector<2x16xf32>,
    %c0_28 = arith.constant 0 : index
    %c96 = arith.constant 96 : index
    %28 = vector.load %arg15[%c0_28, %c96] : memref<2x128xf32, #tpu.memory_space<vmem>>, vector<2x16xf32>
    %c12 = arith.constant 12 : index
    %c0_29 = arith.constant 0 : index
    %29 = vector.load %arg16[%c12, %c0_29] : memref<16x16xf32, #tpu.memory_space<vmem>>, vector<2x16xf32>
    tpu.vector_store %arg16[%c12, %c0_29], %28 {strides = array<i32>} : memref<16x16xf32, #tpu.memory_space<vmem>>, vector<2x16xf32>,
    %c0_30 = arith.constant 0 : index
    %c112 = arith.constant 112 : index
    %30 = vector.load %arg15[%c0_30, %c112] : memref<2x128xf32, #tpu.memory_space<vmem>>, vector<2x16xf32>
    %c14 = arith.constant 14 : index
    %c0_31 = arith.constant 0 : index
    %31 = vector.load %arg16[%c14, %c0_31] : memref<16x16xf32, #tpu.memory_space<vmem>>, vector<2x16xf32>
    tpu.vector_store %arg16[%c14, %c0_31], %30 {strides = array<i32>} : memref<16x16xf32, #tpu.memory_space<vmem>>, vector<2x16xf32>,
    %c0_32 = arith.constant 0 : index
    %c0_33 = arith.constant 0 : index
    %32 = vector.load %arg16[%c0_32, %c0_33] : memref<16x16xf32, #tpu.memory_space<vmem>>, vector<16x16xf32>
    %cst_34 = arith.constant 0.000000e+00 : f32
    %33 = vector.broadcast %cst_34 : f32 to vector<16x128xf32>
    %c0_35 = arith.constant 0 : index
    %c0_36 = arith.constant 0 : index
    %34 = vector.load %arg17[%c0_35, %c0_36] : memref<16x128xf32, #tpu.memory_space<vmem>>, vector<16x128xf32>
    tpu.vector_store %arg17[%c0_35, %c0_36], %33 {strides = array<i32>} : memref<16x128xf32, #tpu.memory_space<vmem>>, vector<16x128xf32>,
    %cst_37 = arith.constant 0.000000e+00 : f32
    %35 = vector.broadcast %cst_37 : f32 to vector<8x384xf32>
    %c0_38 = arith.constant 0 : index
    %c0_39 = arith.constant 0 : index
    %36 = vector.load %arg18[%c0_38, %c0_39] : memref<8x384xf32, #tpu.memory_space<vmem>>, vector<8x384xf32>
    tpu.vector_store %arg18[%c0_38, %c0_39], %35 {strides = array<i32>} : memref<8x384xf32, #tpu.memory_space<vmem>>, vector<8x384xf32>,
    %cst_40 = arith.constant 1.000000e+00 : f32
    %37 = vector.broadcast %cst_40 : f32 to vector<16x64xf32>
    %c144 = arith.constant 144 : index
    %c0_41 = arith.constant 0 : index
    %38 = vector.load %arg19[%c144, %c0_41] : memref<160x64xf32, #tpu.memory_space<vmem>>, vector<16x64xf32>
    tpu.vector_store %arg19[%c144, %c0_41], %37 {strides = array<i32>} : memref<160x64xf32, #tpu.memory_space<vmem>>, vector<16x64xf32>,
    %cst_42 = arith.constant 1.000000e+00 : f32
    %39 = vector.broadcast %cst_42 : f32 to vector<8x256xf32>
    %c72 = arith.constant 72 : index
    %c0_43 = arith.constant 0 : index
    %40 = vector.load %arg20[%c72, %c0_43] : memref<80x256xf32, #tpu.memory_space<vmem>>, vector<8x256xf32>
    tpu.vector_store %arg20[%c72, %c0_43], %39 {strides = array<i32>} : memref<80x256xf32, #tpu.memory_space<vmem>>, vector<8x256xf32>,
    %41 = tpu.iota {dimensions = array<i32: 1>} : vector<16x64xi32>
    %c3_i32 = arith.constant 3 : i32
    %42 = vector.broadcast %c3_i32 : i32 to vector<16x64xi32>
    %43 = arith.shrsi %41, %42 : vector<16x64xi32>
    %c7_i32 = arith.constant 7 : i32
    %44 = vector.broadcast %c7_i32 : i32 to vector<16x64xi32>
    %45 = arith.andi %41, %44 : vector<16x64xi32>
    %c1_i32 = arith.constant 1 : i32
    %46 = vector.broadcast %c1_i32 : i32 to vector<16x64xi32>
    %47 = arith.cmpi sge, %43, %46 : vector<16x64xi32>
    %c1_i32_44 = arith.constant 1 : i32
    %48 = vector.broadcast %c1_i32_44 : i32 to vector<16x64xi32>
    %49 = arith.cmpi sge, %45, %48 : vector<16x64xi32>
    %50 = arith.andi %47, %49 : vector<16x64xi1>
    %51 = arith.extui %50 : vector<16x64xi1> to vector<16x64xi32>
    %52 = arith.sitofp %51 : vector<16x64xi32> to vector<16x64xf32>
    %c1_i32_45 = arith.constant 1 : i32
    %53 = vector.broadcast %c1_i32_45 : i32 to vector<16x64xi32>
    %54 = arith.cmpi sge, %43, %53 : vector<16x64xi32>
    %55 = arith.extui %54 : vector<16x64xi1> to vector<16x64xi32>
    %56 = arith.sitofp %55 : vector<16x64xi32> to vector<16x64xf32>
    %c1_i32_46 = arith.constant 1 : i32
    %57 = vector.broadcast %c1_i32_46 : i32 to vector<16x64xi32>
    %58 = arith.cmpi sge, %43, %57 : vector<16x64xi32>
    %c6_i32 = arith.constant 6 : i32
    %59 = vector.broadcast %c6_i32 : i32 to vector<16x64xi32>
    %60 = arith.cmpi sle, %45, %59 : vector<16x64xi32>
    %61 = arith.andi %58, %60 : vector<16x64xi1>
    %62 = arith.extui %61 : vector<16x64xi1> to vector<16x64xi32>
    %63 = arith.sitofp %62 : vector<16x64xi32> to vector<16x64xf32>
    %c1_i32_47 = arith.constant 1 : i32
    %64 = vector.broadcast %c1_i32_47 : i32 to vector<16x64xi32>
    %65 = arith.cmpi sge, %45, %64 : vector<16x64xi32>
    %66 = arith.extui %65 : vector<16x64xi1> to vector<16x64xi32>
    %67 = arith.sitofp %66 : vector<16x64xi32> to vector<16x64xf32>
    %c6_i32_48 = arith.constant 6 : i32
    %68 = vector.broadcast %c6_i32_48 : i32 to vector<16x64xi32>
    %69 = arith.cmpi sle, %45, %68 : vector<16x64xi32>
    %70 = arith.extui %69 : vector<16x64xi1> to vector<16x64xi32>
    %71 = arith.sitofp %70 : vector<16x64xi32> to vector<16x64xf32>
    %c6_i32_49 = arith.constant 6 : i32
    %72 = vector.broadcast %c6_i32_49 : i32 to vector<16x64xi32>
    %73 = arith.cmpi sle, %43, %72 : vector<16x64xi32>
    %c1_i32_50 = arith.constant 1 : i32
    %74 = vector.broadcast %c1_i32_50 : i32 to vector<16x64xi32>
    %75 = arith.cmpi sge, %45, %74 : vector<16x64xi32>
    %76 = arith.andi %73, %75 : vector<16x64xi1>
    %77 = arith.extui %76 : vector<16x64xi1> to vector<16x64xi32>
    %78 = arith.sitofp %77 : vector<16x64xi32> to vector<16x64xf32>
    %c6_i32_51 = arith.constant 6 : i32
    %79 = vector.broadcast %c6_i32_51 : i32 to vector<16x64xi32>
    %80 = arith.cmpi sle, %43, %79 : vector<16x64xi32>
    %81 = arith.extui %80 : vector<16x64xi1> to vector<16x64xi32>
    %82 = arith.sitofp %81 : vector<16x64xi32> to vector<16x64xf32>
    %c6_i32_52 = arith.constant 6 : i32
    %83 = vector.broadcast %c6_i32_52 : i32 to vector<16x64xi32>
    %84 = arith.cmpi sle, %43, %83 : vector<16x64xi32>
    %c6_i32_53 = arith.constant 6 : i32
    %85 = vector.broadcast %c6_i32_53 : i32 to vector<16x64xi32>
    %86 = arith.cmpi sle, %45, %85 : vector<16x64xi32>
    %87 = arith.andi %84, %86 : vector<16x64xi1>
    %88 = arith.extui %87 : vector<16x64xi1> to vector<16x64xi32>
    %89 = arith.sitofp %88 : vector<16x64xi32> to vector<16x64xf32>
    %90 = tpu.iota {dimensions = array<i32: 1>} : vector<8x256xi32>
    %c4_i32 = arith.constant 4 : i32
    %91 = vector.broadcast %c4_i32 : i32 to vector<8x256xi32>
    %92 = arith.shrsi %90, %91 : vector<8x256xi32>
    %c15_i32 = arith.constant 15 : i32
    %93 = vector.broadcast %c15_i32 : i32 to vector<8x256xi32>
    %94 = arith.andi %90, %93 : vector<8x256xi32>
    %c1_i32_54 = arith.constant 1 : i32
    %95 = vector.broadcast %c1_i32_54 : i32 to vector<8x256xi32>
    %96 = arith.cmpi sge, %92, %95 : vector<8x256xi32>
    %c1_i32_55 = arith.constant 1 : i32
    %97 = vector.broadcast %c1_i32_55 : i32 to vector<8x256xi32>
    %98 = arith.cmpi sge, %94, %97 : vector<8x256xi32>
    %99 = arith.andi %96, %98 : vector<8x256xi1>
    %100 = arith.extui %99 : vector<8x256xi1> to vector<8x256xi32>
    %101 = arith.sitofp %100 : vector<8x256xi32> to vector<8x256xf32>
    %c1_i32_56 = arith.constant 1 : i32
    %102 = vector.broadcast %c1_i32_56 : i32 to vector<8x256xi32>
    %103 = arith.cmpi sge, %92, %102 : vector<8x256xi32>
    %104 = arith.extui %103 : vector<8x256xi1> to vector<8x256xi32>
    %105 = arith.sitofp %104 : vector<8x256xi32> to vector<8x256xf32>
    %c1_i32_57 = arith.constant 1 : i32
    %106 = vector.broadcast %c1_i32_57 : i32 to vector<8x256xi32>
    %107 = arith.cmpi sge, %92, %106 : vector<8x256xi32>
    %c14_i32 = arith.constant 14 : i32
    %108 = vector.broadcast %c14_i32 : i32 to vector<8x256xi32>
    %109 = arith.cmpi sle, %94, %108 : vector<8x256xi32>
    %110 = arith.andi %107, %109 : vector<8x256xi1>
    %111 = arith.extui %110 : vector<8x256xi1> to vector<8x256xi32>
    %112 = arith.sitofp %111 : vector<8x256xi32> to vector<8x256xf32>
    %c1_i32_58 = arith.constant 1 : i32
    %113 = vector.broadcast %c1_i32_58 : i32 to vector<8x256xi32>
    %114 = arith.cmpi sge, %94, %113 : vector<8x256xi32>
    %115 = arith.extui %114 : vector<8x256xi1> to vector<8x256xi32>
    %116 = arith.sitofp %115 : vector<8x256xi32> to vector<8x256xf32>
    %c14_i32_59 = arith.constant 14 : i32
    %117 = vector.broadcast %c14_i32_59 : i32 to vector<8x256xi32>
    %118 = arith.cmpi sle, %94, %117 : vector<8x256xi32>
    %119 = arith.extui %118 : vector<8x256xi1> to vector<8x256xi32>
    %120 = arith.sitofp %119 : vector<8x256xi32> to vector<8x256xf32>
    %c14_i32_60 = arith.constant 14 : i32
    %121 = vector.broadcast %c14_i32_60 : i32 to vector<8x256xi32>
    %122 = arith.cmpi sle, %92, %121 : vector<8x256xi32>
    %c1_i32_61 = arith.constant 1 : i32
    %123 = vector.broadcast %c1_i32_61 : i32 to vector<8x256xi32>
    %124 = arith.cmpi sge, %94, %123 : vector<8x256xi32>
    %125 = arith.andi %122, %124 : vector<8x256xi1>
    %126 = arith.extui %125 : vector<8x256xi1> to vector<8x256xi32>
    %127 = arith.sitofp %126 : vector<8x256xi32> to vector<8x256xf32>
    %c14_i32_62 = arith.constant 14 : i32
    %128 = vector.broadcast %c14_i32_62 : i32 to vector<8x256xi32>
    %129 = arith.cmpi sle, %92, %128 : vector<8x256xi32>
    %130 = arith.extui %129 : vector<8x256xi1> to vector<8x256xi32>
    %131 = arith.sitofp %130 : vector<8x256xi32> to vector<8x256xf32>
    %c14_i32_63 = arith.constant 14 : i32
    %132 = vector.broadcast %c14_i32_63 : i32 to vector<8x256xi32>
    %133 = arith.cmpi sle, %92, %132 : vector<8x256xi32>
    %c14_i32_64 = arith.constant 14 : i32
    %134 = vector.broadcast %c14_i32_64 : i32 to vector<8x256xi32>
    %135 = arith.cmpi sle, %94, %134 : vector<8x256xi32>
    %136 = arith.andi %133, %135 : vector<8x256xi1>
    %137 = arith.extui %136 : vector<8x256xi1> to vector<8x256xi32>
    %138 = arith.sitofp %137 : vector<8x256xi32> to vector<8x256xf32>
    %139 = arith.truncf %32 : vector<16x16xf32> to vector<16x16xbf16>
    %c0_65 = arith.constant 0 : index
    %c0_66 = arith.constant 0 : index
    %140 = vector.load %arg6[%c0_65, %c0_66] : memref<16x64xbf16, #tpu.memory_space<vmem>>, vector<16x64xbf16>
    %cst_67 = arith.constant dense<0.000000e+00> : vector<16x64xf32>
    %141 = tpu.matmul %139, %140, %cst_67 {dimension_numbers = #tpu.dot_dimension_numbers<[1], [0], [0], [1], [0, 0, 1, 1], [], []>} : vector<16x16xbf16>, vector<16x64xbf16>, vector<16x64xf32> -> vector<16x64xf32>
    %c0_68 = arith.constant 0 : index
    %c0_69 = arith.constant 0 : index
    %142 = vector.load %arg8[%c0_68, %c0_69] : memref<16x64xf32, #tpu.memory_space<vmem>>, vector<16x64xf32>
    %143 = arith.mulf %141, %142 : vector<16x64xf32>
    %c0_70 = arith.constant 0 : index
    %c32_71 = arith.constant 32 : index
    %144 = vector.load %arg17[%c0_70, %c32_71] : memref<16x128xf32, #tpu.memory_space<vmem>>, vector<16x64xf32>
    tpu.vector_store %arg17[%c0_70, %c32_71], %143 {strides = array<i32>} : memref<16x128xf32, #tpu.memory_space<vmem>>, vector<16x64xf32>,
    %c0_72 = arith.constant 0 : index
    %c23 = arith.constant 23 : index
    %145 = vector.load %arg17[%c0_72, %c23] : memref<16x128xf32, #tpu.memory_space<vmem>>, vector<16x64xf32>
    %146 = arith.mulf %145, %52 : vector<16x64xf32>
    %c0_73 = arith.constant 0 : index
    %c0_74 = arith.constant 0 : index
    %147 = vector.load %arg19[%c0_73, %c0_74] : memref<160x64xf32, #tpu.memory_space<vmem>>, vector<16x64xf32>
    tpu.vector_store %arg19[%c0_73, %c0_74], %146 {strides = array<i32>} : memref<160x64xf32, #tpu.memory_space<vmem>>, vector<16x64xf32>,
    %c0_75 = arith.constant 0 : index
    %c24 = arith.constant 24 : index
    %148 = vector.load %arg17[%c0_75, %c24] : memref<16x128xf32, #tpu.memory_space<vmem>>, vector<16x64xf32>
    %149 = arith.mulf %148, %56 : vector<16x64xf32>
    %c16_76 = arith.constant 16 : index
    %c0_77 = arith.constant 0 : index
    %150 = vector.load %arg19[%c16_76, %c0_77] : memref<160x64xf32, #tpu.memory_space<vmem>>, vector<16x64xf32>
    tpu.vector_store %arg19[%c16_76, %c0_77], %149 {strides = array<i32>} : memref<160x64xf32, #tpu.memory_space<vmem>>, vector<16x64xf32>,
    %c0_78 = arith.constant 0 : index
    %c25 = arith.constant 25 : index
    %151 = vector.load %arg17[%c0_78, %c25] : memref<16x128xf32, #tpu.memory_space<vmem>>, vector<16x64xf32>
    %152 = arith.mulf %151, %63 : vector<16x64xf32>
    %c32_79 = arith.constant 32 : index
    %c0_80 = arith.constant 0 : index
    %153 = vector.load %arg19[%c32_79, %c0_80] : memref<160x64xf32, #tpu.memory_space<vmem>>, vector<16x64xf32>
    tpu.vector_store %arg19[%c32_79, %c0_80], %152 {strides = array<i32>} : memref<160x64xf32, #tpu.memory_space<vmem>>, vector<16x64xf32>,
    %c0_81 = arith.constant 0 : index
    %c31 = arith.constant 31 : index
    %154 = vector.load %arg17[%c0_81, %c31] : memref<16x128xf32, #tpu.memory_space<vmem>>, vector<16x64xf32>
    %155 = arith.mulf %154, %67 : vector<16x64xf32>
    %c48_82 = arith.constant 48 : index
    %c0_83 = arith.constant 0 : index
    %156 = vector.load %arg19[%c48_82, %c0_83] : memref<160x64xf32, #tpu.memory_space<vmem>>, vector<16x64xf32>
    tpu.vector_store %arg19[%c48_82, %c0_83], %155 {strides = array<i32>} : memref<160x64xf32, #tpu.memory_space<vmem>>, vector<16x64xf32>,
    %c64_84 = arith.constant 64 : index
    %c0_85 = arith.constant 0 : index
    %157 = vector.load %arg19[%c64_84, %c0_85] : memref<160x64xf32, #tpu.memory_space<vmem>>, vector<16x64xf32>
    tpu.vector_store %arg19[%c64_84, %c0_85], %143 {strides = array<i32>} : memref<160x64xf32, #tpu.memory_space<vmem>>, vector<16x64xf32>,
    %c0_86 = arith.constant 0 : index
    %c33 = arith.constant 33 : index
    %158 = vector.load %arg17[%c0_86, %c33] : memref<16x128xf32, #tpu.memory_space<vmem>>, vector<16x64xf32>
    %159 = arith.mulf %158, %71 : vector<16x64xf32>
    %c80_87 = arith.constant 80 : index
    %c0_88 = arith.constant 0 : index
    %160 = vector.load %arg19[%c80_87, %c0_88] : memref<160x64xf32, #tpu.memory_space<vmem>>, vector<16x64xf32>
    tpu.vector_store %arg19[%c80_87, %c0_88], %159 {strides = array<i32>} : memref<160x64xf32, #tpu.memory_space<vmem>>, vector<16x64xf32>,
    %c0_89 = arith.constant 0 : index
    %c39 = arith.constant 39 : index
    %161 = vector.load %arg17[%c0_89, %c39] : memref<16x128xf32, #tpu.memory_space<vmem>>, vector<16x64xf32>
    %162 = arith.mulf %161, %78 : vector<16x64xf32>
    %c96_90 = arith.constant 96 : index
    %c0_91 = arith.constant 0 : index
    %163 = vector.load %arg19[%c96_90, %c0_91] : memref<160x64xf32, #tpu.memory_space<vmem>>, vector<16x64xf32>
    tpu.vector_store %arg19[%c96_90, %c0_91], %162 {strides = array<i32>} : memref<160x64xf32, #tpu.memory_space<vmem>>, vector<16x64xf32>,
    %c0_92 = arith.constant 0 : index
    %c40 = arith.constant 40 : index
    %164 = vector.load %arg17[%c0_92, %c40] : memref<16x128xf32, #tpu.memory_space<vmem>>, vector<16x64xf32>
    %165 = arith.mulf %164, %82 : vector<16x64xf32>
    %c112_93 = arith.constant 112 : index
    %c0_94 = arith.constant 0 : index
    %166 = vector.load %arg19[%c112_93, %c0_94] : memref<160x64xf32, #tpu.memory_space<vmem>>, vector<16x64xf32>
    tpu.vector_store %arg19[%c112_93, %c0_94], %165 {strides = array<i32>} : memref<160x64xf32, #tpu.memory_space<vmem>>, vector<16x64xf32>,
    %c0_95 = arith.constant 0 : index
    %c41 = arith.constant 41 : index
    %167 = vector.load %arg17[%c0_95, %c41] : memref<16x128xf32, #tpu.memory_space<vmem>>, vector<16x64xf32>
    %168 = arith.mulf %167, %89 : vector<16x64xf32>
    %c128 = arith.constant 128 : index
    %c0_96 = arith.constant 0 : index
    %169 = vector.load %arg19[%c128, %c0_96] : memref<160x64xf32, #tpu.memory_space<vmem>>, vector<16x64xf32>
    tpu.vector_store %arg19[%c128, %c0_96], %168 {strides = array<i32>} : memref<160x64xf32, #tpu.memory_space<vmem>>, vector<16x64xf32>,
    %c0_97 = arith.constant 0 : index
    %c0_98 = arith.constant 0 : index
    %170 = vector.load %arg19[%c0_97, %c0_98] : memref<160x64xf32, #tpu.memory_space<vmem>>, vector<160x64xf32>
    %171 = arith.truncf %170 : vector<160x64xf32> to vector<160x64xbf16>
    %c0_99 = arith.constant 0 : index
    %c0_100 = arith.constant 0 : index
    %172 = vector.load %arg10[%c0_99, %c0_100] : memref<16x160xbf16, #tpu.memory_space<vmem>>, vector<16x160xbf16>
    %cst_101 = arith.constant dense<0.000000e+00> : vector<16x64xf32>
    %173 = tpu.matmul %172, %171, %cst_101 {dimension_numbers = #tpu.dot_dimension_numbers<[1], [0], [0], [1], [0, 0, 1, 1], [], []>} : vector<16x160xbf16>, vector<160x64xbf16>, vector<16x64xf32> -> vector<16x64xf32>
    %cst_102 = arith.constant 0.000000e+00 : f32
    %174 = vector.broadcast %cst_102 : f32 to vector<16x64xf32>
    %175 = arith.maximumf %173, %174 : vector<16x64xf32>
    %c0_103 = arith.constant 0 : index
    %c32_104 = arith.constant 32 : index
    %176 = vector.load %arg17[%c0_103, %c32_104] : memref<16x128xf32, #tpu.memory_space<vmem>>, vector<16x64xf32>
    tpu.vector_store %arg17[%c0_103, %c32_104], %175 {strides = array<i32>} : memref<16x128xf32, #tpu.memory_space<vmem>>, vector<16x64xf32>,
    %c0_105 = arith.constant 0 : index
    %c23_106 = arith.constant 23 : index
    %177 = vector.load %arg17[%c0_105, %c23_106] : memref<16x128xf32, #tpu.memory_space<vmem>>, vector<16x64xf32>
    %178 = arith.mulf %177, %52 : vector<16x64xf32>
    %c0_107 = arith.constant 0 : index
    %c0_108 = arith.constant 0 : index
    %179 = vector.load %arg19[%c0_107, %c0_108] : memref<160x64xf32, #tpu.memory_space<vmem>>, vector<16x64xf32>
    tpu.vector_store %arg19[%c0_107, %c0_108], %178 {strides = array<i32>} : memref<160x64xf32, #tpu.memory_space<vmem>>, vector<16x64xf32>,
    %c0_109 = arith.constant 0 : index
    %c24_110 = arith.constant 24 : index
    %180 = vector.load %arg17[%c0_109, %c24_110] : memref<16x128xf32, #tpu.memory_space<vmem>>, vector<16x64xf32>
    %181 = arith.mulf %180, %56 : vector<16x64xf32>
    %c16_111 = arith.constant 16 : index
    %c0_112 = arith.constant 0 : index
    %182 = vector.load %arg19[%c16_111, %c0_112] : memref<160x64xf32, #tpu.memory_space<vmem>>, vector<16x64xf32>
    tpu.vector_store %arg19[%c16_111, %c0_112], %181 {strides = array<i32>} : memref<160x64xf32, #tpu.memory_space<vmem>>, vector<16x64xf32>,
    %c0_113 = arith.constant 0 : index
    %c25_114 = arith.constant 25 : index
    %183 = vector.load %arg17[%c0_113, %c25_114] : memref<16x128xf32, #tpu.memory_space<vmem>>, vector<16x64xf32>
    %184 = arith.mulf %183, %63 : vector<16x64xf32>
    %c32_115 = arith.constant 32 : index
    %c0_116 = arith.constant 0 : index
    %185 = vector.load %arg19[%c32_115, %c0_116] : memref<160x64xf32, #tpu.memory_space<vmem>>, vector<16x64xf32>
    tpu.vector_store %arg19[%c32_115, %c0_116], %184 {strides = array<i32>} : memref<160x64xf32, #tpu.memory_space<vmem>>, vector<16x64xf32>,
    %c0_117 = arith.constant 0 : index
    %c31_118 = arith.constant 31 : index
    %186 = vector.load %arg17[%c0_117, %c31_118] : memref<16x128xf32, #tpu.memory_space<vmem>>, vector<16x64xf32>
    %187 = arith.mulf %186, %67 : vector<16x64xf32>
    %c48_119 = arith.constant 48 : index
    %c0_120 = arith.constant 0 : index
    %188 = vector.load %arg19[%c48_119, %c0_120] : memref<160x64xf32, #tpu.memory_space<vmem>>, vector<16x64xf32>
    tpu.vector_store %arg19[%c48_119, %c0_120], %187 {strides = array<i32>} : memref<160x64xf32, #tpu.memory_space<vmem>>, vector<16x64xf32>,
    %c64_121 = arith.constant 64 : index
    %c0_122 = arith.constant 0 : index
    %189 = vector.load %arg19[%c64_121, %c0_122] : memref<160x64xf32, #tpu.memory_space<vmem>>, vector<16x64xf32>
    tpu.vector_store %arg19[%c64_121, %c0_122], %175 {strides = array<i32>} : memref<160x64xf32, #tpu.memory_space<vmem>>, vector<16x64xf32>,
    %c0_123 = arith.constant 0 : index
    %c33_124 = arith.constant 33 : index
    %190 = vector.load %arg17[%c0_123, %c33_124] : memref<16x128xf32, #tpu.memory_space<vmem>>, vector<16x64xf32>
    %191 = arith.mulf %190, %71 : vector<16x64xf32>
    %c80_125 = arith.constant 80 : index
    %c0_126 = arith.constant 0 : index
    %192 = vector.load %arg19[%c80_125, %c0_126] : memref<160x64xf32, #tpu.memory_space<vmem>>, vector<16x64xf32>
    tpu.vector_store %arg19[%c80_125, %c0_126], %191 {strides = array<i32>} : memref<160x64xf32, #tpu.memory_space<vmem>>, vector<16x64xf32>,
    %c0_127 = arith.constant 0 : index
    %c39_128 = arith.constant 39 : index
    %193 = vector.load %arg17[%c0_127, %c39_128] : memref<16x128xf32, #tpu.memory_space<vmem>>, vector<16x64xf32>
    %194 = arith.mulf %193, %78 : vector<16x64xf32>
    %c96_129 = arith.constant 96 : index
    %c0_130 = arith.constant 0 : index
    %195 = vector.load %arg19[%c96_129, %c0_130] : memref<160x64xf32, #tpu.memory_space<vmem>>, vector<16x64xf32>
    tpu.vector_store %arg19[%c96_129, %c0_130], %194 {strides = array<i32>} : memref<160x64xf32, #tpu.memory_space<vmem>>, vector<16x64xf32>,
    %c0_131 = arith.constant 0 : index
    %c40_132 = arith.constant 40 : index
    %196 = vector.load %arg17[%c0_131, %c40_132] : memref<16x128xf32, #tpu.memory_space<vmem>>, vector<16x64xf32>
    %197 = arith.mulf %196, %82 : vector<16x64xf32>
    %c112_133 = arith.constant 112 : index
    %c0_134 = arith.constant 0 : index
    %198 = vector.load %arg19[%c112_133, %c0_134] : memref<160x64xf32, #tpu.memory_space<vmem>>, vector<16x64xf32>
    tpu.vector_store %arg19[%c112_133, %c0_134], %197 {strides = array<i32>} : memref<160x64xf32, #tpu.memory_space<vmem>>, vector<16x64xf32>,
    %c0_135 = arith.constant 0 : index
    %c41_136 = arith.constant 41 : index
    %199 = vector.load %arg17[%c0_135, %c41_136] : memref<16x128xf32, #tpu.memory_space<vmem>>, vector<16x64xf32>
    %200 = arith.mulf %199, %89 : vector<16x64xf32>
    %c128_137 = arith.constant 128 : index
    %c0_138 = arith.constant 0 : index
    %201 = vector.load %arg19[%c128_137, %c0_138] : memref<160x64xf32, #tpu.memory_space<vmem>>, vector<16x64xf32>
    tpu.vector_store %arg19[%c128_137, %c0_138], %200 {strides = array<i32>} : memref<160x64xf32, #tpu.memory_space<vmem>>, vector<16x64xf32>,
    %c0_139 = arith.constant 0 : index
    %c0_140 = arith.constant 0 : index
    %202 = vector.load %arg19[%c0_139, %c0_140] : memref<160x64xf32, #tpu.memory_space<vmem>>, vector<160x64xf32>
    %203 = arith.truncf %202 : vector<160x64xf32> to vector<160x64xbf16>
    %c0_141 = arith.constant 0 : index
    %c0_142 = arith.constant 0 : index
    %204 = vector.load %arg11[%c0_141, %c0_142] : memref<8x160xbf16, #tpu.memory_space<vmem>>, vector<8x160xbf16>
    %cst_143 = arith.constant dense<0.000000e+00> : vector<8x64xf32>
    %205 = tpu.matmul %204, %203, %cst_143 {dimension_numbers = #tpu.dot_dimension_numbers<[1], [0], [0], [1], [0, 0, 1, 1], [], []>} : vector<8x160xbf16>, vector<160x64xbf16>, vector<8x64xf32> -> vector<8x64xf32>
    %cst_144 = arith.constant 0.000000e+00 : f32
    %206 = vector.broadcast %cst_144 : f32 to vector<8x64xf32>
    %207 = arith.maximumf %205, %206 : vector<8x64xf32>
    %208 = arith.truncf %207 : vector<8x64xf32> to vector<8x64xbf16>
    %c0_145 = arith.constant 0 : index
    %c0_146 = arith.constant 0 : index
    %209 = vector.load %arg7[%c0_145, %c0_146] : memref<64x256xbf16, #tpu.memory_space<vmem>>, vector<64x256xbf16>
    %cst_147 = arith.constant dense<0.000000e+00> : vector<8x256xf32>
    %210 = tpu.matmul %208, %209, %cst_147 {dimension_numbers = #tpu.dot_dimension_numbers<[1], [0], [0], [1], [0, 0, 1, 1], [], []>} : vector<8x64xbf16>, vector<64x256xbf16>, vector<8x256xf32> -> vector<8x256xf32>
    %c0_148 = arith.constant 0 : index
    %c0_149 = arith.constant 0 : index
    %211 = vector.load %arg9[%c0_148, %c0_149] : memref<8x256xf32, #tpu.memory_space<vmem>>, vector<8x256xf32>
    %212 = arith.mulf %210, %211 : vector<8x256xf32>
    %c0_150 = arith.constant 0 : index
    %c64_151 = arith.constant 64 : index
    %213 = vector.load %arg18[%c0_150, %c64_151] : memref<8x384xf32, #tpu.memory_space<vmem>>, vector<8x256xf32>
    tpu.vector_store %arg18[%c0_150, %c64_151], %212 {strides = array<i32>} : memref<8x384xf32, #tpu.memory_space<vmem>>, vector<8x256xf32>,
    %c0_152 = arith.constant 0 : index
    %c47 = arith.constant 47 : index
    %214 = vector.load %arg18[%c0_152, %c47] : memref<8x384xf32, #tpu.memory_space<vmem>>, vector<8x256xf32>
    %215 = arith.mulf %214, %101 : vector<8x256xf32>
    %c0_153 = arith.constant 0 : index
    %c0_154 = arith.constant 0 : index
    %216 = vector.load %arg20[%c0_153, %c0_154] : memref<80x256xf32, #tpu.memory_space<vmem>>, vector<8x256xf32>
    tpu.vector_store %arg20[%c0_153, %c0_154], %215 {strides = array<i32>} : memref<80x256xf32, #tpu.memory_space<vmem>>, vector<8x256xf32>,
    %c0_155 = arith.constant 0 : index
    %c48_156 = arith.constant 48 : index
    %217 = vector.load %arg18[%c0_155, %c48_156] : memref<8x384xf32, #tpu.memory_space<vmem>>, vector<8x256xf32>
    %218 = arith.mulf %217, %105 : vector<8x256xf32>
    %c8_157 = arith.constant 8 : index
    %c0_158 = arith.constant 0 : index
    %219 = vector.load %arg20[%c8_157, %c0_158] : memref<80x256xf32, #tpu.memory_space<vmem>>, vector<8x256xf32>
    tpu.vector_store %arg20[%c8_157, %c0_158], %218 {strides = array<i32>} : memref<80x256xf32, #tpu.memory_space<vmem>>, vector<8x256xf32>,
    %c0_159 = arith.constant 0 : index
    %c49 = arith.constant 49 : index
    %220 = vector.load %arg18[%c0_159, %c49] : memref<8x384xf32, #tpu.memory_space<vmem>>, vector<8x256xf32>
    %221 = arith.mulf %220, %112 : vector<8x256xf32>
    %c16_160 = arith.constant 16 : index
    %c0_161 = arith.constant 0 : index
    %222 = vector.load %arg20[%c16_160, %c0_161] : memref<80x256xf32, #tpu.memory_space<vmem>>, vector<8x256xf32>
    tpu.vector_store %arg20[%c16_160, %c0_161], %221 {strides = array<i32>} : memref<80x256xf32, #tpu.memory_space<vmem>>, vector<8x256xf32>,
    %c0_162 = arith.constant 0 : index
    %c63 = arith.constant 63 : index
    %223 = vector.load %arg18[%c0_162, %c63] : memref<8x384xf32, #tpu.memory_space<vmem>>, vector<8x256xf32>
    %224 = arith.mulf %223, %116 : vector<8x256xf32>
    %c24_163 = arith.constant 24 : index
    %c0_164 = arith.constant 0 : index
    %225 = vector.load %arg20[%c24_163, %c0_164] : memref<80x256xf32, #tpu.memory_space<vmem>>, vector<8x256xf32>
    tpu.vector_store %arg20[%c24_163, %c0_164], %224 {strides = array<i32>} : memref<80x256xf32, #tpu.memory_space<vmem>>, vector<8x256xf32>,
    %c32_165 = arith.constant 32 : index
    %c0_166 = arith.constant 0 : index
    %226 = vector.load %arg20[%c32_165, %c0_166] : memref<80x256xf32, #tpu.memory_space<vmem>>, vector<8x256xf32>
    tpu.vector_store %arg20[%c32_165, %c0_166], %212 {strides = array<i32>} : memref<80x256xf32, #tpu.memory_space<vmem>>, vector<8x256xf32>,
    %c0_167 = arith.constant 0 : index
    %c65 = arith.constant 65 : index
    %227 = vector.load %arg18[%c0_167, %c65] : memref<8x384xf32, #tpu.memory_space<vmem>>, vector<8x256xf32>
    %228 = arith.mulf %227, %120 : vector<8x256xf32>
    %c40_168 = arith.constant 40 : index
    %c0_169 = arith.constant 0 : index
    %229 = vector.load %arg20[%c40_168, %c0_169] : memref<80x256xf32, #tpu.memory_space<vmem>>, vector<8x256xf32>
    tpu.vector_store %arg20[%c40_168, %c0_169], %228 {strides = array<i32>} : memref<80x256xf32, #tpu.memory_space<vmem>>, vector<8x256xf32>,
    %c0_170 = arith.constant 0 : index
    %c79 = arith.constant 79 : index
    %230 = vector.load %arg18[%c0_170, %c79] : memref<8x384xf32, #tpu.memory_space<vmem>>, vector<8x256xf32>
    %231 = arith.mulf %230, %127 : vector<8x256xf32>
    %c48_171 = arith.constant 48 : index
    %c0_172 = arith.constant 0 : index
    %232 = vector.load %arg20[%c48_171, %c0_172] : memref<80x256xf32, #tpu.memory_space<vmem>>, vector<8x256xf32>
    tpu.vector_store %arg20[%c48_171, %c0_172], %231 {strides = array<i32>} : memref<80x256xf32, #tpu.memory_space<vmem>>, vector<8x256xf32>,
    %c0_173 = arith.constant 0 : index
    %c80_174 = arith.constant 80 : index
    %233 = vector.load %arg18[%c0_173, %c80_174] : memref<8x384xf32, #tpu.memory_space<vmem>>, vector<8x256xf32>
    %234 = arith.mulf %233, %131 : vector<8x256xf32>
    %c56 = arith.constant 56 : index
    %c0_175 = arith.constant 0 : index
    %235 = vector.load %arg20[%c56, %c0_175] : memref<80x256xf32, #tpu.memory_space<vmem>>, vector<8x256xf32>
    tpu.vector_store %arg20[%c56, %c0_175], %234 {strides = array<i32>} : memref<80x256xf32, #tpu.memory_space<vmem>>, vector<8x256xf32>,
    %c0_176 = arith.constant 0 : index
    %c81 = arith.constant 81 : index
    %236 = vector.load %arg18[%c0_176, %c81] : memref<8x384xf32, #tpu.memory_space<vmem>>, vector<8x256xf32>
    %237 = arith.mulf %236, %138 : vector<8x256xf32>
    %c64_177 = arith.constant 64 : index
    %c0_178 = arith.constant 0 : index
    %238 = vector.load %arg20[%c64_177, %c0_178] : memref<80x256xf32, #tpu.memory_space<vmem>>, vector<8x256xf32>
    tpu.vector_store %arg20[%c64_177, %c0_178], %237 {strides = array<i32>} : memref<80x256xf32, #tpu.memory_space<vmem>>, vector<8x256xf32>,
    %c0_179 = arith.constant 0 : index
    %c0_180 = arith.constant 0 : index
    %239 = vector.load %arg20[%c0_179, %c0_180] : memref<80x256xf32, #tpu.memory_space<vmem>>, vector<80x256xf32>
    %240 = arith.truncf %239 : vector<80x256xf32> to vector<80x256xbf16>
    %c0_181 = arith.constant 0 : index
    %c0_182 = arith.constant 0 : index
    %241 = vector.load %arg12[%c0_181, %c0_182] : memref<8x80xbf16, #tpu.memory_space<vmem>>, vector<8x80xbf16>
    %cst_183 = arith.constant dense<0.000000e+00> : vector<8x256xf32>
    %242 = tpu.matmul %241, %240, %cst_183 {dimension_numbers = #tpu.dot_dimension_numbers<[1], [0], [0], [1], [0, 0, 1, 1], [], []>} : vector<8x80xbf16>, vector<80x256xbf16>, vector<8x256xf32> -> vector<8x256xf32>
    %cst_184 = arith.constant 0.000000e+00 : f32
    %243 = vector.broadcast %cst_184 : f32 to vector<8x256xf32>
    %244 = arith.maximumf %242, %243 : vector<8x256xf32>
    %c0_185 = arith.constant 0 : index
    %c64_186 = arith.constant 64 : index
    %245 = vector.load %arg18[%c0_185, %c64_186] : memref<8x384xf32, #tpu.memory_space<vmem>>, vector<8x256xf32>
    tpu.vector_store %arg18[%c0_185, %c64_186], %244 {strides = array<i32>} : memref<8x384xf32, #tpu.memory_space<vmem>>, vector<8x256xf32>,
    %c0_187 = arith.constant 0 : index
    %c47_188 = arith.constant 47 : index
    %246 = vector.load %arg18[%c0_187, %c47_188] : memref<8x384xf32, #tpu.memory_space<vmem>>, vector<8x256xf32>
    %247 = arith.mulf %246, %101 : vector<8x256xf32>
    %c0_189 = arith.constant 0 : index
    %c0_190 = arith.constant 0 : index
    %248 = vector.load %arg20[%c0_189, %c0_190] : memref<80x256xf32, #tpu.memory_space<vmem>>, vector<8x256xf32>
    tpu.vector_store %arg20[%c0_189, %c0_190], %247 {strides = array<i32>} : memref<80x256xf32, #tpu.memory_space<vmem>>, vector<8x256xf32>,
    %c0_191 = arith.constant 0 : index
    %c48_192 = arith.constant 48 : index
    %249 = vector.load %arg18[%c0_191, %c48_192] : memref<8x384xf32, #tpu.memory_space<vmem>>, vector<8x256xf32>
    %250 = arith.mulf %249, %105 : vector<8x256xf32>
    %c8_193 = arith.constant 8 : index
    %c0_194 = arith.constant 0 : index
    %251 = vector.load %arg20[%c8_193, %c0_194] : memref<80x256xf32, #tpu.memory_space<vmem>>, vector<8x256xf32>
    tpu.vector_store %arg20[%c8_193, %c0_194], %250 {strides = array<i32>} : memref<80x256xf32, #tpu.memory_space<vmem>>, vector<8x256xf32>,
    %c0_195 = arith.constant 0 : index
    %c49_196 = arith.constant 49 : index
    %252 = vector.load %arg18[%c0_195, %c49_196] : memref<8x384xf32, #tpu.memory_space<vmem>>, vector<8x256xf32>
    %253 = arith.mulf %252, %112 : vector<8x256xf32>
    %c16_197 = arith.constant 16 : index
    %c0_198 = arith.constant 0 : index
    %254 = vector.load %arg20[%c16_197, %c0_198] : memref<80x256xf32, #tpu.memory_space<vmem>>, vector<8x256xf32>
    tpu.vector_store %arg20[%c16_197, %c0_198], %253 {strides = array<i32>} : memref<80x256xf32, #tpu.memory_space<vmem>>, vector<8x256xf32>,
    %c0_199 = arith.constant 0 : index
    %c63_200 = arith.constant 63 : index
    %255 = vector.load %arg18[%c0_199, %c63_200] : memref<8x384xf32, #tpu.memory_space<vmem>>, vector<8x256xf32>
    %256 = arith.mulf %255, %116 : vector<8x256xf32>
    %c24_201 = arith.constant 24 : index
    %c0_202 = arith.constant 0 : index
    %257 = vector.load %arg20[%c24_201, %c0_202] : memref<80x256xf32, #tpu.memory_space<vmem>>, vector<8x256xf32>
    tpu.vector_store %arg20[%c24_201, %c0_202], %256 {strides = array<i32>} : memref<80x256xf32, #tpu.memory_space<vmem>>, vector<8x256xf32>,
    %c32_203 = arith.constant 32 : index
    %c0_204 = arith.constant 0 : index
    %258 = vector.load %arg20[%c32_203, %c0_204] : memref<80x256xf32, #tpu.memory_space<vmem>>, vector<8x256xf32>
    tpu.vector_store %arg20[%c32_203, %c0_204], %244 {strides = array<i32>} : memref<80x256xf32, #tpu.memory_space<vmem>>, vector<8x256xf32>,
    %c0_205 = arith.constant 0 : index
    %c65_206 = arith.constant 65 : index
    %259 = vector.load %arg18[%c0_205, %c65_206] : memref<8x384xf32, #tpu.memory_space<vmem>>, vector<8x256xf32>
    %260 = arith.mulf %259, %120 : vector<8x256xf32>
    %c40_207 = arith.constant 40 : index
    %c0_208 = arith.constant 0 : index
    %261 = vector.load %arg20[%c40_207, %c0_208] : memref<80x256xf32, #tpu.memory_space<vmem>>, vector<8x256xf32>
    tpu.vector_store %arg20[%c40_207, %c0_208], %260 {strides = array<i32>} : memref<80x256xf32, #tpu.memory_space<vmem>>, vector<8x256xf32>,
    %c0_209 = arith.constant 0 : index
    %c79_210 = arith.constant 79 : index
    %262 = vector.load %arg18[%c0_209, %c79_210] : memref<8x384xf32, #tpu.memory_space<vmem>>, vector<8x256xf32>
    %263 = arith.mulf %262, %127 : vector<8x256xf32>
    %c48_211 = arith.constant 48 : index
    %c0_212 = arith.constant 0 : index
    %264 = vector.load %arg20[%c48_211, %c0_212] : memref<80x256xf32, #tpu.memory_space<vmem>>, vector<8x256xf32>
    tpu.vector_store %arg20[%c48_211, %c0_212], %263 {strides = array<i32>} : memref<80x256xf32, #tpu.memory_space<vmem>>, vector<8x256xf32>,
    %c0_213 = arith.constant 0 : index
    %c80_214 = arith.constant 80 : index
    %265 = vector.load %arg18[%c0_213, %c80_214] : memref<8x384xf32, #tpu.memory_space<vmem>>, vector<8x256xf32>
    %266 = arith.mulf %265, %131 : vector<8x256xf32>
    %c56_215 = arith.constant 56 : index
    %c0_216 = arith.constant 0 : index
    %267 = vector.load %arg20[%c56_215, %c0_216] : memref<80x256xf32, #tpu.memory_space<vmem>>, vector<8x256xf32>
    tpu.vector_store %arg20[%c56_215, %c0_216], %266 {strides = array<i32>} : memref<80x256xf32, #tpu.memory_space<vmem>>, vector<8x256xf32>,
    %c0_217 = arith.constant 0 : index
    %c81_218 = arith.constant 81 : index
    %268 = vector.load %arg18[%c0_217, %c81_218] : memref<8x384xf32, #tpu.memory_space<vmem>>, vector<8x256xf32>
    %269 = arith.mulf %268, %138 : vector<8x256xf32>
    %c64_219 = arith.constant 64 : index
    %c0_220 = arith.constant 0 : index
    %270 = vector.load %arg20[%c64_219, %c0_220] : memref<80x256xf32, #tpu.memory_space<vmem>>, vector<8x256xf32>
    tpu.vector_store %arg20[%c64_219, %c0_220], %269 {strides = array<i32>} : memref<80x256xf32, #tpu.memory_space<vmem>>, vector<8x256xf32>,
    %c0_221 = arith.constant 0 : index
    %c0_222 = arith.constant 0 : index
    %271 = vector.load %arg20[%c0_221, %c0_222] : memref<80x256xf32, #tpu.memory_space<vmem>>, vector<80x256xf32>
    %272 = arith.truncf %271 : vector<80x256xf32> to vector<80x256xbf16>
    %c0_223 = arith.constant 0 : index
    %c0_224 = arith.constant 0 : index
    %273 = vector.load %arg13[%c0_223, %c0_224] : memref<8x80xbf16, #tpu.memory_space<vmem>>, vector<8x80xbf16>
    %cst_225 = arith.constant dense<0.000000e+00> : vector<8x256xf32>
    %274 = tpu.matmul %273, %272, %cst_225 {dimension_numbers = #tpu.dot_dimension_numbers<[1], [0], [0], [1], [0, 0, 1, 1], [], []>} : vector<8x80xbf16>, vector<80x256xbf16>, vector<8x256xf32> -> vector<8x256xf32>
    %275 = math.tanh %274 : vector<8x256xf32>
    %c0_226 = arith.constant 0 : index
    %c0_227 = arith.constant 0 : index
    %276 = vector.load %arg14[%c0_226, %c0_227] : memref<8x256xf32, #tpu.memory_space<vmem>>, vector<8x256xf32>
    tpu.vector_store %arg14[%c0_226, %c0_227], %275 {strides = array<i32>} : memref<8x256xf32, #tpu.memory_space<vmem>>, vector<8x256xf32>,
    return
  }
  func.func @transform_0(%arg0: i32) -> (i32, i32) {
    %c0_i32 = arith.constant 0 : i32
    %c0_i32_0 = arith.constant 0 : i32
    %c0_i32_1 = arith.constant 0 : i32
    return %c0_i32, %c0_i32_0 : i32, i32
  }
  func.func @transform_1(%arg0: i32) -> (i32, i32) {
    %c0_i32 = arith.constant 0 : i32
    %c0_i32_0 = arith.constant 0 : i32
    %c0_i32_1 = arith.constant 0 : i32
    return %c0_i32, %c0_i32_0 : i32, i32
  }
  func.func @transform_2(%arg0: i32) -> (i32, i32) {
    %c0_i32 = arith.constant 0 : i32
    %c0_i32_0 = arith.constant 0 : i32
    %c0_i32_1 = arith.constant 0 : i32
    return %c0_i32, %c0_i32_0 : i32, i32
  }
  func.func @transform_3(%arg0: i32) -> (i32, i32) {
    %c0_i32 = arith.constant 0 : i32
    %c0_i32_0 = arith.constant 0 : i32
    %c0_i32_1 = arith.constant 0 : i32
    return %c0_i32, %c0_i32_0 : i32, i32
  }
  func.func @transform_4(%arg0: i32) -> (i32, i32) {
    %c0_i32 = arith.constant 0 : i32
    %c0_i32_0 = arith.constant 0 : i32
    %c0_i32_1 = arith.constant 0 : i32
    return %c0_i32, %c0_i32_0 : i32, i32
  }
  func.func @transform_5(%arg0: i32) -> (i32, i32) {
    %c0_i32 = arith.constant 0 : i32
    %c0_i32_0 = arith.constant 0 : i32
    %c0_i32_1 = arith.constant 0 : i32
    return %c0_i32, %c0_i32_0 : i32, i32
  }
  func.func @transform_6(%arg0: i32) -> (i32, i32) {
    %c0_i32 = arith.constant 0 : i32
    %c0_i32_0 = arith.constant 0 : i32
    %c0_i32_1 = arith.constant 0 : i32
    return %c0_i32, %c0_i32_0 : i32, i32
  }
  func.func @transform_7(%arg0: i32) -> (i32, i32) {
    %c0_i32 = arith.constant 0 : i32
    %c0_i32_0 = arith.constant 0 : i32
    %c0_i32_1 = arith.constant 0 : i32
    return %c0_i32, %c0_i32_0 : i32, i32
  }
  func.func @transform_8(%arg0: i32) -> (i32, i32) {
    %c0_i32 = arith.constant 0 : i32
    %c0_i32_0 = arith.constant 0 : i32
    %c0_i32_1 = arith.constant 0 : i32
    return %c0_i32, %c0_i32_0 : i32, i32
  }
  func.func @transform_9(%arg0: i32) -> (i32, i32) {
    %c0_i32 = arith.constant 0 : i32
    %c0_i32_0 = arith.constant 0 : i32
    %c0_i32_1 = arith.constant 0 : i32
    return %c0_i32, %c0_i32_0 : i32, i32
  }
  func.func @transform_10(%arg0: i32) -> (i32, i32) {
    %c0_i32 = arith.constant 0 : i32
    %c0_i32_0 = arith.constant 0 : i32
    %c0_i32_1 = arith.constant 0 : i32
    return %c0_i32, %c0_i32_0 : i32, i32
  }
  func.func @transform_11(%arg0: i32) -> (i32, i32) {
    %c0_i32 = arith.constant 0 : i32
    %c0_i32_0 = arith.constant 0 : i32
    %c0_i32_1 = arith.constant 0 : i32
    return %c0_i32, %c0_i32_0 : i32, i32
  }
  func.func @transform_12(%arg0: i32) -> (i32, i32) {
    %c0_i32 = arith.constant 0 : i32
    %c0_i32_0 = arith.constant 0 : i32
    %c0_i32_1 = arith.constant 0 : i32
    return %c0_i32, %c0_i32_0 : i32, i32
  }
  func.func @transform_13(%arg0: i32) -> (i32, i32) {
    %c0_i32 = arith.constant 0 : i32
    %c0_i32_0 = arith.constant 0 : i32
    %c0_i32_1 = arith.constant 0 : i32
    return %c0_i32, %c0_i32_0 : i32, i32
  }
}

</mosaic_0001>

<bundles_post_ra>
// kernel: cae_decoder_forward.1
= control target key start
LH: loop header
LB: loop body
LE: loop exit
PB: predicated region body
PF: predicated region fallthrough
CT: control target
= control target key end

     0   :  { %v1839_v0 = vmov 0.0|0.0   ;;  %vm1840_vm0 = vmmov 0   ;;  %v1841_v3 = vmov 0.0   ;;  %vm55_vm1 = vcmask 130048   ;;  %s1843_s23 = smov 112   ;;  %s1845_s26 = smov 96   ;;  %s2621_s1 = inlined_call_operand.vmem [shape: f32[16,32], index: 1, kind: input, shape index: {}]   ;;  %s2622_s3 = inlined_call_operand.vmem [shape: f32[32,128], index: 3, kind: input, shape index: {}]   ;;  %s2623_s0 = inlined_call_operand.vmem [shape: f32[2,16], index: 0, kind: input, shape index: {}]   ;;  %s2624_s2 = inlined_call_operand.vmem [shape: f32[1,32], index: 2, kind: input, shape index: {}]   ;;  %s2625_s4 = inlined_call_operand.vmem [shape: f32[1,128], index: 4, kind: input, shape index: {}]   ;;  %s2626_s5 = inlined_call_operand.vmem [shape: bf16[16,64], index: 5, kind: input, shape index: {}]   ;;  %s2627_s7 = inlined_call_operand.vmem [shape: f32[16,64], index: 7, kind: input, shape index: {}]   ;;  %s2628_s9 = inlined_call_operand.vmem [shape: bf16[16,160], index: 9, kind: input, shape index: {}]   ;;  %s2629_s10 = inlined_call_operand.vmem [shape: bf16[8,160], index: 10, kind: input, shape index: {}]   ;;  %s2630_s6 = inlined_call_operand.vmem [shape: bf16[64,256], index: 6, kind: input, shape index: {}]   ;;  %s2631_s8 = inlined_call_operand.vmem [shape: f32[8,256], index: 8, kind: input, shape index: {}]   ;;  %s2632_s11 = inlined_call_operand.vmem [shape: bf16[8,80], index: 11, kind: input, shape index: {}]   ;;  %s2633_s12 = inlined_call_operand.vmem [shape: bf16[8,80], index: 12, kind: input, shape index: {}]   ;;  %s2634_s13 = inlined_call_operand.vmem [shape: f32[8,256], index: 13, kind: output, shape index: {}]  }
   0x1   :  { %1654 = vmatprep.subr.bf16.mxu1 %v1839_v0  ;;  %v46_v1 = vld [vmem:[%s2621_s1] sm:$0xff]  ;;  %v47_v2 = vld [vmem:[%s2621_s1 + $0x8] sm:$0xff]  ;;  %1634 = vmatprep.mubr.msk.f32.mxu1 %vm1840_vm0, %v1841_v3  ;;  %264 = vst [vmem:[#allocation4] sm:$0xff] %v1841_v3  ;;  %265 = vst [vmem:[#allocation4 + $0x8] sm:$0xff] %v1841_v3  ;;  %vm141_vm2 = vcmask 261120   ;;  %vm218_vm3 = vcmask 123904   ;;  %v274_v41 = vlaneseq }
   0x2   :  { %266 = vst [vmem:[#allocation5] sm:$0xff] %v1841_v3  ;;  %268 = vst [vmem:[#allocation5 + $0x10] sm:$0xff] %v1841_v3  ;;  %v1655_v4 = vpack.c.bf16 %v47_v2, %v46_v1  ;;  %v130_v5 = vld [vmem:[%s2622_s3] sm:$0xff]  ;;  %v131_v6 = vld [vmem:[%s2622_s3 + $0x8] sm:$0xff]  ;;  %s1846_s27 = smov 32   ;;  %s1847_s28 = smov 48  }
   0x3   :  { %v45_v7 = vld [vmem:[%s2623_s0] sm:$0x3]  ;;  %v1658_v8 = vpack.c.bf16 %v131_v6, %v130_v5  ;;  %v132_v9 = vld [vmem:[%s2622_s3 + $0x10] sm:$0xff]  ;;  %v133_v10 = vld [vmem:[%s2622_s3 + $0x18] sm:$0xff]  ;;  %s1848_s29 = smov 16   ;;  %v1999_v42 = vand.u32 127, %v274_v41 }
   0x4   :  { %1656 = vmatpush3.bf16.msra.mxu1 %v1655_v4  ;;  %v1661_v11 = vpack.c.bf16 %v133_v10, %v132_v9  ;;  %v1573_v12 = vld [vmem:[%s2624_s2] ss:$0 sm:$0xff]  ;;  %s1842_s2 = smov 80   ;;  %vm269_vm6 = vcmask 523264   ;;  %v409_v49 = vld [vmem:[%s2627_s7 + $0x8] sm:$0xff]  ;;  %s1850_s15 = smov 24  }
   0x5   :  { %1657 = vmatprep.subr.bf16.mxu1 %v1839_v0  ;;  %v1575_v17 = vld [vmem:[%s2625_s4] ss:$0 sm:$0xff]  ;;  %s1844_s4 = smov 64   ;;  %v276_v43 = vshra.s32 %v1999_v42, 3  ;;  %v277_v44 = vand.u32 7, %v1999_v42  ;;  %s1851_s16 = smov 25  }
   0x6   :  { %v1817_v25 = vld [vmem:[%s2626_s5] sm:$0xff]   ;;  %s1852_s17 = smov 31   ;;  %s1853_s18 = smov 33   ;;  %vm420_vm13 = vcmask 785664  }
   0x7   :  { %1635 = vmatmul.mubr.msk.f32.vlgmr.msra.gmra.mrb[0].mxu1 %vm55_vm1, %v45_v7  ;;  %v408_v45 = vld [vmem:[%s2627_s7] sm:$0xff]  ;;  %vm2006_vm4 = vcmp.ge.s32.totalorder %v276_v43, 1  ;;  %vm2010_vm5 = vcmp.ge.s32.totalorder %v277_v44, 1  ;;  %vm2021_vm8 = vcmp.le.s32.totalorder %v277_v44, 6  ;;  %s1849_s7 = smov 23   ;;  %vm2038_vm10 = vcmp.le.s32.totalorder %v276_v43, 6 }
   0x8   :  { %1659 = vmatpush3.bf16.msra.mxu1 %v1658_v8  ;;  %1645 = vmatprep.mubr.msk.f32.mxu1 %vm1840_vm0, %v1841_v3  ;;  %vm280_vm7 = vmand %vm2006_vm4, %vm2010_vm5  ;;  %v1578_v57 = vsel %vm2006_vm4, 1.0, %v1841_v3  ;;  %v1580_v60 = vsel %vm2010_vm5, 1.0, %v1841_v3  ;;  %v1581_v61 = vsel %vm2021_vm8, 1.0, %v1841_v3  ;;  %v1583_v63 = vsel %vm2038_vm10, 1.0, %v1841_v3  ;;  %s1854_s19 = smov 39   ;;  %s1855_s20 = smov 40  }
   0x9   :  { %1660 = vmatprep.subr.bf16.mxu1 %v1839_v0  ;;  %v1577_v56 = vsel %vm280_vm7, 1.0, %v1841_v3  ;;  %vm286_vm9 = vmand %vm2006_vm4, %vm2021_vm8  ;;  %s1856_s0 = smov 41   ;;  %v1857_v7 = vmov 0   ;;  %s1858_s21 = smov 105  }
   0xa   :  { %v1579_v58 = vsel %vm286_vm9, 1.0, %v1841_v3  ;;  %vm294_vm11 = vmand %vm2038_vm10, %vm2010_vm5  ;;  %613 = vmatprep.subr.bf16.mxu0 %v1857_v7  ;;  %s1859_s22 = smov 104   ;;  %s1860_s3 = smov 103  }
   0xb   :  { %v1582_v62 = vsel %vm294_vm11, 1.0, %v1841_v3  ;;  %vm299_vm12 = vmand %vm2038_vm10, %vm2021_vm8  ;;  %s1862_s24 = smov 95   ;;  %s1863_s25 = smov 89  }
   0xc   :  { %1662 = vmatpush3.bf16.msra.mxu1 %v1661_v11  ;;  %v1584_v0 = vsel %vm299_vm12, 1.0, %v1841_v3  ;;  %s1868_s14 = smov 49   ;;  %s1869_s1 = smov 63  }
   0xd   :  { %1648 = vmatprep.subr.bf16.mxu1 %v1841_v3 }
  0xda   :  { %v125_v13 = vpop.f32.mrb[0].mxu1 }
  0xdb   :  { %v126_v14 = vadd.f32 %v1573_v12, %v125_v13  ;;  %v1636_v15 = vpop.f32.mrb[1].mxu1 }
  0xdd   :  { %v129_v16 = vmax.f32 %v126_v14, 0.0 }
  0xdf   :  { %1646 = vmatmul.mubr.msk.f32.vlgmr.msra.gmra.mrb[2].mxu1 %vm141_vm2, %v129_v16 }
  0xe0   :  { %1650 = vmatprep.mubr.msk.bf16.mxu1 %vm1840_vm0, %v1841_v3  ;;  %1649 = vmatpush3.bf16.msra.mxu1 %v1817_v25 }
  0xe1   :  { %820 = vmatprep.subr.bf16.mxu1 %v1857_v7 }
 0x1b2   :  { %v211_v18 = vpop.f32.mrb[2].mxu1 }
 0x1b3   :  { %v212_v19 = vadd.f32 %v1575_v17, %v211_v18  ;;  %v1647_v20 = vpop.f32.mrb[3].mxu1 }
 0x1b5   :  { %v215_v21 = vmax.f32 %v212_v19, 0.0 }
 0x1b7   :  { %216 = vst [vmem:[#allocation2] sm:$0x3] %v215_v21 }
 0x1be   :  { %v232_v22 = vld [vmem:[#allocation2] sm:$0x3] }
 0x1bf   :  { %v220_v23 = vld [vmem:[#allocation2] sm:$0x3]  ;;  %234 = vrot.lane.b32.xlu1 %v232_v22, %s1842_s2 }
 0x1c0   :  { %222 = vrot.lane.b32.xlu0 %v220_v23, %s1843_s23  ;;  %v217_v24 = vld [vmem:[#allocation2] sm:$0x3]  ;;  %s1861_s23 = smov 97  }
 0x1c1   :  { %219 = vst.msk [vmem:[#allocation3] sm:$0x3] %vm218_vm3, %v217_v24  ;;  %v238_v26 = vld [vmem:[#allocation2] sm:$0x3] }
 0x1c2   :  { %v226_v27 = vld [vmem:[#allocation2] sm:$0x3] }
 0x1c3   :  { %240 = vrot.lane.b32.xlu1 %v238_v26, %s1844_s4  ;;  %v250_v28 = vld [vmem:[#allocation2] sm:$0x3] }
 0x1c4   :  { %228 = vrot.lane.b32.xlu0 %v226_v27, %s1845_s26  ;;  %v244_v29 = vld [vmem:[#allocation2] sm:$0x3]  ;;  %s1864_s26 = smov 88  }
 0x1c5   :  { %v256_v30 = vld [vmem:[#allocation2] sm:$0x3] }
 0x1c7   :  { %252 = vrot.lane.b32.xlu1 %v250_v28, %s1846_s27 }
 0x1c8   :  { %246 = vrot.lane.b32.xlu0 %v244_v29, %s1847_s28 }
 0x1cc   :  { %258 = vrot.lane.b32.xlu0 %v256_v30, %s1848_s29  ;;  %v1865_v30 = vmov 1.0   ;;  %s1866_s29 = smov 87  }
 0x1cd   :  { %270 = vst.msk [vmem:[#allocation6 + $0x90] sm:$0xff] %vm269_vm6, %v1865_v30  ;;  %271 = vst.msk [vmem:[#allocation6 + $0x98] sm:$0xff] %vm269_vm6, %v1865_v30 }
 0x231   :  { %v235_v31 = vpop.permute.xlu1 %234 }
 0x232   :  { %v223_v32 = vpop.permute.xlu0 %222  ;;  %237 = vst.msk [vmem:[#allocation3 + $0x6] sm:$0x3] %vm218_vm3, %v235_v31 }
 0x233   :  { %225 = vst.msk [vmem:[#allocation3 + $0x2] sm:$0x3] %vm218_vm3, %v223_v32  ;;  %v1820_v32 = vld [vmem:[%s2628_s9 + $0x4] ss:$8 sps:$4 sm:$0xff]  }
 0x234   :  { %1605 = vmatprep.mubr.msk.bf16.mxu0 %vm141_vm2, %v1820_v32 }
 0x235   :  { %v241_v33 = vpop.permute.xlu1 %240 }
 0x236   :  { %v229_v34 = vpop.permute.xlu0 %228  ;;  %243 = vst.msk [vmem:[#allocation3 + $0x8] sm:$0x3] %vm218_vm3, %v241_v33 }
 0x237   :  { %231 = vst.msk [vmem:[#allocation3 + $0x4] sm:$0x3] %vm218_vm3, %v229_v34 }
 0x239   :  { %v253_v35 = vpop.permute.xlu1 %252 }
 0x23a   :  { %v247_v36 = vpop.permute.xlu0 %246  ;;  %255 = vst.msk [vmem:[#allocation3 + $0xc] sm:$0x3] %vm218_vm3, %v253_v35 }
 0x23b   :  { %249 = vst.msk [vmem:[#allocation3 + $0xa] sm:$0x3] %vm218_vm3, %v247_v36 }
 0x23e   :  { %v259_v37 = vpop.permute.xlu0 %258  ;;  %v262_v38 = vld [vmem:[#allocation3] sm:$0xff] }
 0x23f   :  { %261 = vst.msk [vmem:[#allocation3 + $0xe] sm:$0x3] %vm218_vm3, %v259_v37 }
 0x246   :  { %v263_v39 = vld [vmem:[#allocation3 + $0x8] sm:$0xff] }
 0x247   :  { %v355_v40 = vpack.c.bf16 %v263_v39, %v262_v38 }
 0x249   :  { %1651 = vmatmul.mubr.msk.bf16.vlgmr.msra.gmra.mrb[4].mxu1 %vm55_vm1, %v355_v40 }
 0x31c   :  { %v401_v48 = vpop.f32.mrb[4].mxu1 }
 0x31d   :  { %v410_v50 = vmul.f32 %v408_v45, %v401_v48  ;;  %v1652_v51 = vpop.f32.mrb[5].mxu1 }
 0x31e   :  { %v404_v52 = vpop.f32.mrb[6].mxu1 }
 0x31f   :  { %495 = vst.msk [vmem:[#allocation6 + $0x40] sm:$0xff] %vm269_vm6, %v410_v50  ;;  %v411_v54 = vmul.f32 %v409_v49, %v404_v52  ;;  %414 = vrot.lane.b32.xlu1 %v410_v50, %s1846_s27  ;;  %v1653_v55 = vpop.f32.mrb[7].mxu1 }
 0x321   :  { %496 = vst.msk [vmem:[#allocation6 + $0x48] sm:$0xff] %vm269_vm6, %v411_v54  ;;  %416 = vrot.lane.b32.xlu0 %v411_v54, %s1846_s27 }
 0x323   :  { %426 = vrot.lane.b32.xlu1 %v1577_v56, %s1849_s7  ;;  %s1872_s7 = smov 81  }
 0x325   :  { %444 = vrot.lane.b32.xlu0 %v1578_v57, %s1850_s15 }
 0x327   :  { %462 = vrot.lane.b32.xlu1 %v1579_v58, %s1851_s16 }
 0x328   :  { %v578_v59 = vld [vmem:[#allocation6 + $0x48] sm:$0xff] }
 0x329   :  { %480 = vrot.lane.b32.xlu0 %v1580_v60, %s1852_s17 }
 0x32b   :  { %500 = vrot.lane.b32.xlu1 %v1581_v61, %s1853_s18  ;;  %v577_v61 = vld [vmem:[#allocation6 + $0x40] sm:$0xff] }
 0x32d   :  { %518 = vrot.lane.b32.xlu0 %v1582_v62, %s1854_s19  ;;  %v593_v62 = vpack.c.bf16 %v578_v59, %v577_v61 }
 0x32f   :  { %536 = vrot.lane.b32.xlu1 %v1583_v63, %s1855_s20 }
 0x331   :  { %554 = vrot.lane.b32.xlu0 %v1584_v0, %s1856_s0 }
 0x391   :  { %v415_v1 = vpop.permute.xlu1 %414 }
 0x392   :  { %421 = vst.msk [vmem:[#allocation4] sm:$0xff] %vm420_vm13, %v415_v1 }
 0x393   :  { %v417_v2 = vpop.permute.xlu0 %416 }
 0x394   :  { %422 = vst.msk [vmem:[#allocation4 + $0x8] sm:$0xff] %vm420_vm13, %v417_v2 }
 0x395   :  { %v2063_v4 = vpop.permute.xlu1 %426 }
 0x397   :  { %v2070_v10 = vpop.permute.xlu0 %444 }
 0x399   :  { %v423_v5 = vld [vmem:[#allocation4] sm:$0xff]  ;;  %v2074_v12 = vpop.permute.xlu1 %462 }
 0x39a   :  { %v429_v6 = vmul.f32 %v2063_v4, %v423_v5  ;;  %v447_v11 = vmul.f32 %v2070_v10, %v423_v5  ;;  %v465_v14 = vmul.f32 %v2074_v12, %v423_v5 }
 0x39b   :  { %v424_v8 = vld [vmem:[#allocation4 + $0x8] sm:$0xff]  ;;  %v2080_v15 = vpop.permute.xlu0 %480 }
 0x39c   :  { %433 = vrot.lane.b32.xlu1 %v429_v6, %s1858_s21  ;;  %v430_v9 = vmul.f32 %v2063_v4, %v424_v8  ;;  %v448_v13 = vmul.f32 %v2070_v10, %v424_v8  ;;  %v466_v16 = vmul.f32 %v2074_v12, %v424_v8  ;;  %v483_v17 = vmul.f32 %v2080_v15, %v423_v5 }
 0x39d   :  { %v2086_v18 = vpop.permute.xlu1 %500  ;;  %v484_v19 = vmul.f32 %v2080_v15, %v424_v8 }
 0x39e   :  { %435 = vrot.lane.b32.xlu0 %v430_v9, %s1858_s21  ;;  %v503_v20 = vmul.f32 %v2086_v18, %v423_v5  ;;  %v504_v22 = vmul.f32 %v2086_v18, %v424_v8 }
 0x39f   :  { %v2092_v21 = vpop.permute.xlu0 %518 }
 0x3a0   :  { %451 = vrot.lane.b32.xlu1 %v447_v11, %s1859_s22  ;;  %v521_v23 = vmul.f32 %v2092_v21, %v423_v5  ;;  %v522_v25 = vmul.f32 %v2092_v21, %v424_v8 }
 0x3a1   :  { %v2098_v24 = vpop.permute.xlu1 %536 }
 0x3a2   :  { %453 = vrot.lane.b32.xlu0 %v448_v13, %s1859_s22  ;;  %v539_v26 = vmul.f32 %v2098_v24, %v423_v5  ;;  %v540_v28 = vmul.f32 %v2098_v24, %v424_v8 }
 0x3a3   :  { %v2104_v27 = vpop.permute.xlu0 %554 }
 0x3a4   :  { %469 = vrot.lane.b32.xlu1 %v465_v14, %s1860_s3  ;;  %v557_v29 = vmul.f32 %v2104_v27, %v423_v5  ;;  %v558_v31 = vmul.f32 %v2104_v27, %v424_v8 }
 0x3a6   :  { %471 = vrot.lane.b32.xlu0 %v466_v16, %s1860_s3 }
 0x3a8   :  { %487 = vrot.lane.b32.xlu1 %v483_v17, %s1861_s23 }
 0x3aa   :  { %489 = vrot.lane.b32.xlu0 %v484_v19, %s1861_s23  ;;  %v587_v19 = vld [vmem:[#allocation6 + $0x90] sm:$0xff] }
 0x3ac   :  { %507 = vrot.lane.b32.xlu1 %v503_v20, %s1862_s24  ;;  %v588_v20 = vld [vmem:[#allocation6 + $0x98] sm:$0xff] }
 0x3ae   :  { %509 = vrot.lane.b32.xlu0 %v504_v22, %s1862_s24 }
 0x3b0   :  { %525 = vrot.lane.b32.xlu1 %v521_v23, %s1863_s25  ;;  %v2145_v23 = vpack.c.bf16 %v588_v20, %v587_v19 }
 0x3b2   :  { %527 = vrot.lane.b32.xlu0 %v522_v25, %s1863_s25  ;;  %v1818_v25 = vld [vmem:[%s2628_s9] ss:$8 sps:$4 sm:$0xff]   ;;  %s1870_s9 = smov 65  }
 0x3b4   :  { %543 = vrot.lane.b32.xlu1 %v539_v26, %s1864_s26 }
 0x3b6   :  { %545 = vrot.lane.b32.xlu0 %v540_v28, %s1864_s26 }
 0x3b8   :  { %561 = vrot.lane.b32.xlu1 %v557_v29, %s1866_s29 }
 0x3ba   :  { %563 = vrot.lane.b32.xlu0 %v558_v31, %s1866_s29 }
 0x40e   :  { %v434_v33 = vpop.permute.xlu1 %433 }
 0x40f   :  { %439 = vst.msk [vmem:[#allocation6] sm:$0xff] %vm269_vm6, %v434_v33 }
 0x410   :  { %v436_v34 = vpop.permute.xlu0 %435 }
 0x411   :  { %440 = vst.msk [vmem:[#allocation6 + $0x8] sm:$0xff] %vm269_vm6, %v436_v34 }
 0x412   :  { %v452_v35 = vpop.permute.xlu1 %451 }
 0x413   :  { %457 = vst.msk [vmem:[#allocation6 + $0x10] sm:$0xff] %vm269_vm6, %v452_v35 }
 0x414   :  { %v454_v36 = vpop.permute.xlu0 %453 }
 0x415   :  { %458 = vst.msk [vmem:[#allocation6 + $0x18] sm:$0xff] %vm269_vm6, %v454_v36 }
 0x416   :  { %v470_v37 = vpop.permute.xlu1 %469  ;;  %v569_v39 = vld [vmem:[#allocation6] sm:$0xff] }
 0x417   :  { %475 = vst.msk [vmem:[#allocation6 + $0x20] sm:$0xff] %vm269_vm6, %v470_v37 }
 0x418   :  { %v472_v38 = vpop.permute.xlu0 %471  ;;  %v570_v40 = vld [vmem:[#allocation6 + $0x8] sm:$0xff] }
 0x419   :  { %476 = vst.msk [vmem:[#allocation6 + $0x28] sm:$0xff] %vm269_vm6, %v472_v38  ;;  %v589_v41 = vpack.c.bf16 %v570_v40, %v569_v39 }
 0x41a   :  { %v488_v43 = vpop.permute.xlu1 %487  ;;  %v571_v45 = vld [vmem:[#allocation6 + $0x10] sm:$0xff] }
 0x41b   :  { %493 = vst.msk [vmem:[#allocation6 + $0x30] sm:$0xff] %vm269_vm6, %v488_v43  ;;  %614 = vmatpush1.bf16.msra.mxu0 %v589_v41 }
 0x41c   :  { %v490_v44 = vpop.permute.xlu0 %489  ;;  %615 = vmatprep.subr.bf16.mxu0 %v1857_v7  ;;  %v572_v46 = vld [vmem:[#allocation6 + $0x18] sm:$0xff] }
 0x41d   :  { %494 = vst.msk [vmem:[#allocation6 + $0x38] sm:$0xff] %vm269_vm6, %v490_v44  ;;  %v590_v47 = vpack.c.bf16 %v572_v46, %v571_v45 }
 0x41e   :  { %v508_v48 = vpop.permute.xlu1 %507  ;;  %v573_v50 = vld [vmem:[#allocation6 + $0x20] sm:$0xff] }
 0x41f   :  { %513 = vst.msk [vmem:[#allocation6 + $0x50] sm:$0xff] %vm269_vm6, %v508_v48  ;;  %616 = vmatpush1.bf16.msra.mxu0 %v590_v47 }
 0x420   :  { %v510_v49 = vpop.permute.xlu0 %509  ;;  %617 = vmatprep.subr.bf16.mxu0 %v1857_v7  ;;  %v574_v51 = vld [vmem:[#allocation6 + $0x28] sm:$0xff] }
 0x421   :  { %514 = vst.msk [vmem:[#allocation6 + $0x58] sm:$0xff] %vm269_vm6, %v510_v49  ;;  %v591_v52 = vpack.c.bf16 %v574_v51, %v573_v50  ;;  %v1828_v51 = vld [vmem:[%s2630_s6 + $0x14] ss:$8 sps:$4 sm:$0xff]  }
 0x422   :  { %v526_v53 = vpop.permute.xlu1 %525  ;;  %v575_v55 = vld [vmem:[#allocation6 + $0x30] sm:$0xff] }
 0x423   :  { %531 = vst.msk [vmem:[#allocation6 + $0x60] sm:$0xff] %vm269_vm6, %v526_v53  ;;  %618 = vmatpush1.bf16.msra.mxu0 %v591_v52  ;;  %v1826_v52 = vld [vmem:[%s2630_s6 + $0x10] ss:$8 sps:$4 sm:$0xff]   ;;  %v1831_v53 = vld [vmem:[%s2630_s6 + $0x24] ss:$8 sps:$4 sm:$0xff]  }
 0x424   :  { %v528_v54 = vpop.permute.xlu0 %527  ;;  %619 = vmatprep.subr.bf16.mxu0 %v1857_v7  ;;  %v576_v56 = vld [vmem:[#allocation6 + $0x38] sm:$0xff] }
 0x425   :  { %532 = vst.msk [vmem:[#allocation6 + $0x68] sm:$0xff] %vm269_vm6, %v528_v54  ;;  %v592_v57 = vpack.c.bf16 %v576_v56, %v575_v55  ;;  %v1829_v54 = vld [vmem:[%s2630_s6 + $0x20] ss:$8 sps:$4 sm:$0xff]  }
 0x426   :  { %v544_v58 = vpop.permute.xlu1 %543  ;;  %v579_v2 = vld [vmem:[#allocation6 + $0x50] sm:$0xff] }
 0x427   :  { %549 = vst.msk [vmem:[#allocation6 + $0x70] sm:$0xff] %vm269_vm6, %v544_v58  ;;  %620 = vmatpush1.bf16.msra.mxu0 %v592_v57 }
 0x428   :  { %v546_v60 = vpop.permute.xlu0 %545  ;;  %621 = vmatprep.subr.bf16.mxu0 %v1857_v7  ;;  %v580_v0 = vld [vmem:[#allocation6 + $0x58] sm:$0xff] }
 0x429   :  { %550 = vst.msk [vmem:[#allocation6 + $0x78] sm:$0xff] %vm269_vm6, %v546_v60  ;;  %v594_v5 = vpack.c.bf16 %v580_v0, %v579_v2 }
 0x42a   :  { %v562_v63 = vpop.permute.xlu1 %561  ;;  %v581_v8 = vld [vmem:[#allocation6 + $0x60] sm:$0xff] }
 0x42b   :  { %567 = vst.msk [vmem:[#allocation6 + $0x80] sm:$0xff] %vm269_vm6, %v562_v63  ;;  %622 = vmatpush1.bf16.msra.mxu0 %v593_v62 }
 0x42c   :  { %v564_v1 = vpop.permute.xlu0 %563  ;;  %623 = vmatprep.subr.bf16.mxu0 %v1857_v7  ;;  %v582_v6 = vld [vmem:[#allocation6 + $0x68] sm:$0xff] }
 0x42d   :  { %568 = vst.msk [vmem:[#allocation6 + $0x88] sm:$0xff] %vm269_vm6, %v564_v1  ;;  %v595_v9 = vpack.c.bf16 %v582_v6, %v581_v8 }
 0x42e   :  { %v583_v13 = vld [vmem:[#allocation6 + $0x70] sm:$0xff] }
 0x42f   :  { %624 = vmatpush1.bf16.msra.mxu0 %v594_v5 }
 0x430   :  { %625 = vmatprep.subr.bf16.mxu0 %v1857_v7  ;;  %v584_v11 = vld [vmem:[#allocation6 + $0x78] sm:$0xff] }
 0x431   :  { %v596_v14 = vpack.c.bf16 %v584_v11, %v583_v13 }
 0x432   :  { %v585_v17 = vld [vmem:[#allocation6 + $0x80] sm:$0xff] }
 0x433   :  { %626 = vmatpush1.bf16.msra.mxu0 %v595_v9 }
 0x434   :  { %627 = vmatprep.subr.bf16.mxu0 %v1857_v7  ;;  %v586_v16 = vld [vmem:[#allocation6 + $0x88] sm:$0xff] }
 0x435   :  { %v597_v22 = vpack.c.bf16 %v586_v16, %v585_v17 }
 0x437   :  { %628 = vmatpush1.bf16.msra.mxu0 %v596_v14 }
 0x438   :  { %629 = vmatprep.subr.bf16.mxu0 %v1857_v7 }
 0x43b   :  { %630 = vmatpush1.bf16.msra.mxu0 %v597_v22 }
 0x43c   :  { %631 = vmatprep.subr.bf16.mxu0 %v1857_v7 }
 0x43f   :  { %632 = vmatpush1.bf16.msra.mxu0 %v2145_v23 }
 0x442   :  { %646 = vmatmul.mubr.bf16.vlgmr.msra.gmra.mrb[0].mxu0 %v1818_v25 }
 0x443   :  { %945 = vmatprep.mubr.bf16.mxu0 %v1857_v7 }
 0x515   :  { %v647_v26 = vpop.f32.mrb[0].mxu0 }
 0x516   :  { %v654_v28 = vmax.f32 %v647_v26, 0.0  ;;  %v649_v29 = vpop.f32.mrb[1].mxu0 }
 0x517   :  { %v650_v31 = vpop.f32.mrb[2].mxu0 }
 0x518   :  { %722 = vst.msk [vmem:[#allocation6 + $0x40] sm:$0xff] %vm269_vm6, %v654_v28  ;;  %v655_v32 = vmax.f32 %v650_v31, 0.0  ;;  %658 = vrot.lane.b32.xlu1 %v654_v28, %s1846_s27  ;;  %v652_v33 = vpop.f32.mrb[3].mxu0 }
 0x51a   :  { %723 = vst.msk [vmem:[#allocation6 + $0x48] sm:$0xff] %vm269_vm6, %v655_v32  ;;  %660 = vrot.lane.b32.xlu0 %v655_v32, %s1846_s27  ;;  %s1871_s27 = smov 79  }
 0x51f   :  { %v788_v29 = vld [vmem:[#allocation6 + $0x40] sm:$0xff] }
 0x521   :  { %v789_v26 = vld [vmem:[#allocation6 + $0x48] sm:$0xff] }
 0x522   :  { %v804_v31 = vpack.c.bf16 %v789_v26, %v788_v29 }
 0x58a   :  { %v659_v34 = vpop.permute.xlu1 %658 }
 0x58b   :  { %664 = vst.msk [vmem:[#allocation4] sm:$0xff] %vm420_vm13, %v659_v34 }
 0x58c   :  { %v661_v35 = vpop.permute.xlu0 %660 }
 0x58d   :  { %665 = vst.msk [vmem:[#allocation4 + $0x8] sm:$0xff] %vm420_vm13, %v661_v35 }
 0x592   :  { %v666_v36 = vld [vmem:[#allocation4] sm:$0xff] }
 0x593   :  { %v668_v37 = vmul.f32 %v666_v36, %v2063_v4  ;;  %v682_v40 = vmul.f32 %v666_v36, %v2070_v10  ;;  %v696_v43 = vmul.f32 %v666_v36, %v2074_v12 }
 0x594   :  { %v667_v38 = vld [vmem:[#allocation4 + $0x8] sm:$0xff] }
 0x595   :  { %672 = vrot.lane.b32.xlu1 %v668_v37, %s1858_s21  ;;  %v669_v39 = vmul.f32 %v667_v38, %v2063_v4  ;;  %v683_v41 = vmul.f32 %v667_v38, %v2070_v10  ;;  %v697_v44 = vmul.f32 %v667_v38, %v2074_v12  ;;  %v710_v4 = vmul.f32 %v666_v36, %v2080_v15 }
 0x596   :  { %v711_v45 = vmul.f32 %v667_v38, %v2080_v15  ;;  %v726_v10 = vmul.f32 %v666_v36, %v2086_v18  ;;  %v727_v46 = vmul.f32 %v667_v38, %v2086_v18  ;;  %v740_v12 = vmul.f32 %v666_v36, %v2092_v21 }
 0x597   :  { %674 = vrot.lane.b32.xlu0 %v669_v39, %s1858_s21  ;;  %v741_v47 = vmul.f32 %v667_v38, %v2092_v21  ;;  %v754_v15 = vmul.f32 %v666_v36, %v2098_v24  ;;  %v755_v48 = vmul.f32 %v667_v38, %v2098_v24  ;;  %v768_v18 = vmul.f32 %v666_v36, %v2104_v27  ;;  %v2194_v21 = vld [vmem:[%s2629_s10] sm:$0xff] }
 0x598   :  { %v769_v49 = vmul.f32 %v667_v38, %v2104_v27  ;;  %v1607_v50 = vcombine.high %v2194_v21, %v2194_v21  ;;  %v1823_v24 = vld [vmem:[%s2630_s6] ss:$8 sps:$4 sm:$0xff]   ;;  %v1825_v27 = vld [vmem:[%s2630_s6 + $0x4] ss:$8 sps:$4 sm:$0xff]  }
 0x599   :  { %686 = vrot.lane.b32.xlu1 %v682_v40, %s1859_s22  ;;  %913 = vmatprep.subr.bf16.mxu0 %v1825_v27 }
 0x59a   :  { %1608 = vmatprep.mubr.msk.bf16.mxu1 %vm141_vm2, %v1607_v50  ;;  %914 = vmatpush1.bf16.msra.mxu0 %v1823_v24  ;;  %v303_v50 = vshra.s32 %v1999_v42, 4  ;;  %v305_v24 = vand.u32 15, %v1999_v42 }
 0x59b   :  { %688 = vrot.lane.b32.xlu0 %v683_v41, %s1859_s22  ;;  %915 = vmatprep.subr.bf16.mxu0 %v1828_v51 }
 0x59c   :  { %vm2257_vm14 = vcmp.ge.s32.totalorder %v303_v50, 1  ;;  %vm2261_vm15 = vcmp.ge.s32.totalorder %v305_v24, 1  ;;  %vm2281_vm4 = vcmp.le.s32.totalorder %v305_v24, 14  ;;  %vm2315_vm9 = vcmp.le.s32.totalorder %v303_v50, 14 }
 0x59d   :  { %700 = vrot.lane.b32.xlu1 %v696_v43, %s1860_s3  ;;  %vm311_vm2 = vmand %vm2257_vm14, %vm2261_vm15 }
 0x59e   :  { %916 = vmatpush1.bf16.msra.mxu0 %v1826_v52  ;;  %vm323_vm7 = vmand %vm2257_vm14, %vm2281_vm4 }
 0x59f   :  { %702 = vrot.lane.b32.xlu0 %v697_v44, %s1860_s3  ;;  %917 = vmatprep.subr.bf16.mxu0 %v1831_v53  ;;  %vm339_vm11 = vmand %vm2315_vm9, %vm2261_vm15 }
 0x5a0   :  { %v1595_v26 = vsel %vm339_vm11, 1.0, %v1841_v3  ;;  %vm349_vm13 = vmand %vm2315_vm9, %vm2281_vm4 }
 0x5a1   :  { %714 = vrot.lane.b32.xlu1 %v710_v4, %s1861_s23 }
 0x5a2   :  { %918 = vmatpush1.bf16.msra.mxu0 %v1829_v54 }
 0x5a3   :  { %716 = vrot.lane.b32.xlu0 %v711_v45, %s1861_s23 }
 0x5a5   :  { %730 = vrot.lane.b32.xlu1 %v726_v10, %s1862_s24  ;;  %v1606_v10 = vcombine.low %v2194_v21, %v2194_v21 }
 0x5a7   :  { %732 = vrot.lane.b32.xlu0 %v727_v46, %s1862_s24  ;;  %v1834_v46 = vld [vmem:[%s2630_s6 + $0x34] ss:$8 sps:$4 sm:$0xff]  }
 0x5a8   :  { %919 = vmatprep.subr.bf16.mxu0 %v1834_v46 }
 0x5a9   :  { %744 = vrot.lane.b32.xlu1 %v740_v12, %s1863_s25  ;;  %v1832_v12 = vld [vmem:[%s2630_s6 + $0x30] ss:$8 sps:$4 sm:$0xff]  }
 0x5aa   :  { %920 = vmatpush1.bf16.msra.mxu0 %v1832_v12 }
 0x5ab   :  { %746 = vrot.lane.b32.xlu0 %v741_v47, %s1863_s25 }
 0x5ad   :  { %758 = vrot.lane.b32.xlu1 %v754_v15, %s1864_s26 }
 0x5af   :  { %760 = vrot.lane.b32.xlu0 %v755_v48, %s1864_s26 }
 0x5b1   :  { %772 = vrot.lane.b32.xlu1 %v768_v18, %s1866_s29 }
 0x5b3   :  { %774 = vrot.lane.b32.xlu0 %v769_v49, %s1866_s29 }
 0x607   :  { %v673_v55 = vpop.permute.xlu1 %672 }
 0x608   :  { %678 = vst.msk [vmem:[#allocation6] sm:$0xff] %vm269_vm6, %v673_v55  ;;  %v954_v55 = vld [vmem:[%s2631_s8] sm:$0xff] }
 0x609   :  { %v675_v56 = vpop.permute.xlu0 %674 }
 0x60a   :  { %679 = vst.msk [vmem:[#allocation6 + $0x8] sm:$0xff] %vm269_vm6, %v675_v56 }
 0x60b   :  { %v687_v57 = vpop.permute.xlu1 %686 }
 0x60c   :  { %692 = vst.msk [vmem:[#allocation6 + $0x10] sm:$0xff] %vm269_vm6, %v687_v57  ;;  %v955_v57 = vld [vmem:[%s2631_s8 + $0x8] sm:$0xff]  ;;  %s1867_s8 = smov 47  }
 0x60d   :  { %v689_v58 = vpop.permute.xlu0 %688 }
 0x60e   :  { %693 = vst.msk [vmem:[#allocation6 + $0x18] sm:$0xff] %vm269_vm6, %v689_v58 }
 0x60f   :  { %v701_v59 = vpop.permute.xlu1 %700  ;;  %v780_v61 = vld [vmem:[#allocation6] sm:$0xff] }
 0x610   :  { %706 = vst.msk [vmem:[#allocation6 + $0x20] sm:$0xff] %vm269_vm6, %v701_v59  ;;  %v1585_v59 = vsel %vm311_vm2, 1.0, %v1841_v3  ;;  %vm1047_vm2 = vcmask 400384  }
 0x611   :  { %v703_v60 = vpop.permute.xlu0 %702  ;;  %v781_v62 = vld [vmem:[#allocation6 + $0x8] sm:$0xff] }
 0x612   :  { %707 = vst.msk [vmem:[#allocation6 + $0x28] sm:$0xff] %vm269_vm6, %v703_v60  ;;  %v800_v63 = vpack.c.bf16 %v781_v62, %v780_v61 }
 0x613   :  { %v715_v0 = vpop.permute.xlu1 %714  ;;  %v782_v2 = vld [vmem:[#allocation6 + $0x10] sm:$0xff] }
 0x614   :  { %720 = vst.msk [vmem:[#allocation6 + $0x30] sm:$0xff] %vm269_vm6, %v715_v0  ;;  %821 = vmatpush1.bf16.msra.mxu1 %v800_v63  ;;  %v1587_v63 = vsel %vm2257_vm14, 1.0, %v1841_v3 }
 0x615   :  { %v717_v1 = vpop.permute.xlu0 %716  ;;  %822 = vmatprep.subr.bf16.mxu1 %v1857_v7  ;;  %v783_v5 = vld [vmem:[#allocation6 + $0x18] sm:$0xff] }
 0x616   :  { %721 = vst.msk [vmem:[#allocation6 + $0x38] sm:$0xff] %vm269_vm6, %v717_v1  ;;  %v801_v6 = vpack.c.bf16 %v783_v5, %v782_v2 }
 0x617   :  { %v731_v8 = vpop.permute.xlu1 %730  ;;  %v784_v11 = vld [vmem:[#allocation6 + $0x20] sm:$0xff] }
 0x618   :  { %736 = vst.msk [vmem:[#allocation6 + $0x50] sm:$0xff] %vm269_vm6, %v731_v8  ;;  %823 = vmatpush1.bf16.msra.mxu1 %v801_v6 }
 0x619   :  { %v733_v9 = vpop.permute.xlu0 %732  ;;  %824 = vmatprep.subr.bf16.mxu1 %v1857_v7  ;;  %v785_v13 = vld [vmem:[#allocation6 + $0x28] sm:$0xff] }
 0x61a   :  { %737 = vst.msk [vmem:[#allocation6 + $0x58] sm:$0xff] %vm269_vm6, %v733_v9  ;;  %v802_v14 = vpack.c.bf16 %v785_v13, %v784_v11  ;;  %v1589_v13 = vsel %vm323_vm7, 1.0, %v1841_v3  ;;  %vm1064_vm7 = vcmask 646144  }
 0x61b   :  { %v745_v16 = vpop.permute.xlu1 %744  ;;  %v786_v19 = vld [vmem:[#allocation6 + $0x30] sm:$0xff] }
 0x61c   :  { %750 = vst.msk [vmem:[#allocation6 + $0x60] sm:$0xff] %vm269_vm6, %v745_v16  ;;  %825 = vmatpush1.bf16.msra.mxu1 %v802_v14  ;;  %v1591_v16 = vsel %vm2261_vm15, 1.0, %v1841_v3  ;;  %vm968_vm15 = vcmask 1048064  }
 0x61d   :  { %v747_v17 = vpop.permute.xlu0 %746  ;;  %826 = vmatprep.subr.bf16.mxu1 %v1857_v7  ;;  %v787_v20 = vld [vmem:[#allocation6 + $0x38] sm:$0xff] }
 0x61e   :  { %751 = vst.msk [vmem:[#allocation6 + $0x68] sm:$0xff] %vm269_vm6, %v747_v17  ;;  %v803_v22 = vpack.c.bf16 %v787_v20, %v786_v19 }
 0x61f   :  { %v759_v25 = vpop.permute.xlu1 %758  ;;  %v790_v35 = vld [vmem:[#allocation6 + $0x50] sm:$0xff] }
 0x620   :  { %764 = vst.msk [vmem:[#allocation6 + $0x70] sm:$0xff] %vm269_vm6, %v759_v25  ;;  %827 = vmatpush1.bf16.msra.mxu1 %v803_v22  ;;  %v1593_v22 = vsel %vm2281_vm4, 1.0, %v1841_v3  ;;  %vm1097_vm4 = vcmask 531456  }
 0x621   :  { %v761_v28 = vpop.permute.xlu0 %760  ;;  %828 = vmatprep.subr.bf16.mxu1 %v1857_v7  ;;  %v791_v33 = vld [vmem:[#allocation6 + $0x58] sm:$0xff] }
 0x622   :  { %765 = vst.msk [vmem:[#allocation6 + $0x78] sm:$0xff] %vm269_vm6, %v761_v28  ;;  %v805_v36 = vpack.c.bf16 %v791_v33, %v790_v35 }
 0x623   :  { %v773_v32 = vpop.permute.xlu1 %772  ;;  %v792_v38 = vld [vmem:[#allocation6 + $0x60] sm:$0xff] }
 0x624   :  { %778 = vst.msk [vmem:[#allocation6 + $0x80] sm:$0xff] %vm269_vm6, %v773_v32  ;;  %829 = vmatpush1.bf16.msra.mxu1 %v804_v31  ;;  %v1597_v32 = vsel %vm2315_vm9, 1.0, %v1841_v3 }
 0x625   :  { %v775_v34 = vpop.permute.xlu0 %774  ;;  %830 = vmatprep.subr.bf16.mxu1 %v1857_v7  ;;  %v793_v37 = vld [vmem:[#allocation6 + $0x68] sm:$0xff] }
 0x626   :  { %779 = vst.msk [vmem:[#allocation6 + $0x88] sm:$0xff] %vm269_vm6, %v775_v34  ;;  %v806_v39 = vpack.c.bf16 %v793_v37, %v792_v38  ;;  %v1599_v34 = vsel %vm349_vm13, 1.0, %v1841_v3 }
 0x627   :  { %v794_v41 = vld [vmem:[#allocation6 + $0x70] sm:$0xff] }
 0x628   :  { %831 = vmatpush1.bf16.msra.mxu1 %v805_v36 }
 0x629   :  { %832 = vmatprep.subr.bf16.mxu1 %v1857_v7  ;;  %v795_v40 = vld [vmem:[#allocation6 + $0x78] sm:$0xff] }
 0x62a   :  { %v807_v43 = vpack.c.bf16 %v795_v40, %v794_v41 }
 0x62b   :  { %v796_v4 = vld [vmem:[#allocation6 + $0x80] sm:$0xff] }
 0x62c   :  { %833 = vmatpush1.bf16.msra.mxu1 %v806_v39 }
 0x62d   :  { %834 = vmatprep.subr.bf16.mxu1 %v1857_v7  ;;  %v797_v44 = vld [vmem:[#allocation6 + $0x88] sm:$0xff] }
 0x62e   :  { %v808_v45 = vpack.c.bf16 %v797_v44, %v796_v4 }
 0x630   :  { %835 = vmatpush1.bf16.msra.mxu1 %v807_v43 }
 0x631   :  { %836 = vmatprep.subr.bf16.mxu1 %v1857_v7 }
 0x634   :  { %837 = vmatpush1.bf16.msra.mxu1 %v808_v45 }
 0x635   :  { %838 = vmatprep.subr.bf16.mxu1 %v1857_v7 }
 0x638   :  { %839 = vmatpush1.bf16.msra.mxu1 %v2145_v23  ;;  %v302_v23 = vadd.s32 128, %v1999_v42 }
 0x63a   :  { %v304_v27 = vshra.s32 %v302_v23, 4  ;;  %v306_v51 = vand.u32 15, %v302_v23 }
 0x63b   :  { %853 = vmatmul.mubr.bf16.vlgmr.msra.gmra.mrb[8].mxu1 %v1606_v10 }
 0x63c   :  { %1296 = vmatprep.mubr.bf16.mxu1 %v1857_v7  ;;  %vm2265_vm0 = vcmp.ge.s32.totalorder %v304_v27, 1  ;;  %vm2269_vm1 = vcmp.ge.s32.totalorder %v306_v51, 1  ;;  %vm2288_vm5 = vcmp.le.s32.totalorder %v306_v51, 14  ;;  %vm2321_vm10 = vcmp.le.s32.totalorder %v304_v27, 14 }
 0x63d   :  { %vm312_vm3 = vmand %vm2265_vm0, %vm2269_vm1  ;;  %v1588_v0 = vsel %vm2265_vm0, 1.0, %v1841_v3  ;;  %v1592_v17 = vsel %vm2269_vm1, 1.0, %v1841_v3  ;;  %v1594_v25 = vsel %vm2288_vm5, 1.0, %v1841_v3  ;;  %v1598_v33 = vsel %vm2321_vm10, 1.0, %v1841_v3 }
 0x63e   :  { %v1586_v60 = vsel %vm312_vm3, 1.0, %v1841_v3  ;;  %vm324_vm8 = vmand %vm2265_vm0, %vm2288_vm5  ;;  %v1702_v11 = vpack.i.bf16 %v1588_v0, %v1587_v63  ;;  %v1712_v20 = vpack.i.bf16 %v1592_v17, %v1591_v16  ;;  %v1717_v29 = vpack.i.bf16 %v1594_v25, %v1593_v22 }
 0x63f   :  { %v1697_v8 = vpack.i.bf16 %v1586_v60, %v1585_v59  ;;  %v1590_v14 = vsel %vm324_vm8, 1.0, %v1841_v3  ;;  %vm340_vm12 = vmand %vm2321_vm10, %vm2269_vm1  ;;  %v1727_v36 = vpack.i.bf16 %v1598_v33, %v1597_v32  ;;  %vm1014_vm0 = vcmask 392192  }
 0x640   :  { %v1707_v19 = vpack.i.bf16 %v1590_v14, %v1589_v13  ;;  %v1596_v28 = vsel %vm340_vm12, 1.0, %v1841_v3  ;;  %vm350_vm14 = vmand %vm2321_vm10, %vm2288_vm5  ;;  %vm981_vm1 = vcmask 384000   ;;  %vm1080_vm3 = vcmask 515072  }
 0x641   :  { %v1722_v31 = vpack.i.bf16 %v1596_v28, %v1595_v26  ;;  %v1600_v35 = vsel %vm350_vm14, 1.0, %v1841_v3  ;;  %vm1031_vm5 = vcmask 654336   ;;  %vm998_vm8 = vcmask 662528  }
 0x642   :  { %v1732_v37 = vpack.i.bf16 %v1600_v35, %v1599_v34 }
 0x70e   :  { %v854_v47 = vpop.f32.mrb[8].mxu1 }
 0x70f   :  { %v860_v15 = vmax.f32 %v854_v47, 0.0  ;;  %v856_v48 = vpop.f32.mrb[9].mxu1 }
 0x710   :  { %v857_v18 = vpop.f32.mrb[10].mxu1 }
 0x711   :  { %v861_v49 = vpack.c.bf16 %v860_v15, %v860_v15  ;;  %v858_v21 = vpop.f32.mrb[11].mxu1 }
 0x713   :  { %1617 = vmatmul.mubr.msk.bf16.vlgmr.msra.gmra.mrb[4].mxu0 %vm269_vm6, %v861_v49 }
 0x714   :  { %1556 = vmatprep.mubr.bf16.mxu0 %v1857_v7 }
 0x7e6   :  { %v947_v58 = vpop.f32.mrb[4].mxu0 }
 0x7e7   :  { %v2301_v61 = vmul.f32 %v954_v55, %v947_v58  ;;  %v949_v62 = vpop.f32.mrb[5].mxu0 }
 0x7e8   :  { %v2313_v1 = vmul.f32 %v955_v57, %v949_v62  ;;  %v951_v2 = vpop.f32.mrb[6].mxu0 }
 0x7e9   :  { %960 = vrot.lane.b32.xlu1 %v2301_v61, %s1844_s4  ;;  %v952_v6 = vpop.f32.mrb[7].mxu0 }
 0x7ea   :  { %962 = vrot.lane.b32.xlu0 %v2313_v1, %s1844_s4 }
 0x7ed   :  { %1698 = vrot.lane.b32.xlu1 %v1697_v8, %s1867_s8 }
 0x7ee   :  { %1703 = vrot.lane.b32.xlu0 %v1702_v11, %s1847_s28 }
 0x7f1   :  { %1708 = vrot.lane.b32.xlu1 %v1707_v19, %s1868_s14 }
 0x7f2   :  { %1713 = vrot.lane.b32.xlu0 %v1712_v20, %s1869_s1 }
 0x7f5   :  { %1718 = vrot.lane.b32.xlu1 %v1717_v29, %s1870_s9 }
 0x7f6   :  { %1723 = vrot.lane.b32.xlu0 %v1722_v31, %s1871_s27 }
 0x7f9   :  { %1728 = vrot.lane.b32.xlu1 %v1727_v36, %s1842_s2 }
 0x7fa   :  { %1733 = vrot.lane.b32.xlu0 %v1732_v37, %s1872_s7 }
 0x85b   :  { %v961_v38 = vpop.permute.xlu1 %960 }
 0x85c   :  { %969 = vst.msk [vmem:[#allocation5] sm:$0xff] %vm968_vm15, %v961_v38  ;;  %v963_v39 = vpop.permute.xlu0 %962 }
 0x85d   :  { %971 = vst.msk [vmem:[#allocation5 + $0x10] sm:$0xff] %vm269_vm6, %v963_v39  ;;  %v964_v24 = vsel %vm269_vm6, %v961_v38, %v963_v39 }
 0x85f   :  { %v1699_v3 = vpop.permute.xlu1 %1698 }
 0x860   :  { %v1704_v40 = vpop.permute.xlu0 %1703  ;;  %v2381_v44 = vunpack.i.h.bf16 %v1699_v3  ;;  %v2383_v4 = vunpack.i.l.bf16 %v1699_v3 }
 0x861   :  { %v2377_v41 = vunpack.i.h.bf16 %v1704_v40  ;;  %v2379_v43 = vunpack.i.l.bf16 %v1704_v40 }
 0x862   :  { %v2409_v50 = vsel %vm981_vm1, %v2383_v4, %v2381_v44 }
 0x863   :  { %v1709_v45 = vpop.permute.xlu1 %1708  ;;  %v2385_v10 = vld [vmem:[#allocation5] sm:$0xff]  ;;  %v2400_v49 = vsel %vm1014_vm0, %v2379_v43, %v2377_v41  ;;  %v987_v56 = vmul.f32 %v2409_v50, %v964_v24 }
 0x864   :  { %v2387_v46 = vunpack.i.h.bf16 %v1709_v45  ;;  %v2389_v12 = vunpack.i.l.bf16 %v1709_v45  ;;  %v1714_v47 = vpop.permute.xlu0 %1713  ;;  %v986_v15 = vmul.f32 %v2383_v4, %v2385_v10  ;;  %v1019_v48 = vmul.f32 %v2379_v43, %v2385_v10  ;;  %v2395_v18 = vld [vmem:[#allocation5 + $0x10] sm:$0xff] }
 0x865   :  { %v2402_v21 = vunpack.i.h.bf16 %v1714_v47  ;;  %v2404_v23 = vunpack.i.l.bf16 %v1714_v47  ;;  %v988_v52 = vmul.f32 %v2381_v44, %v2395_v18  ;;  %v1020_v7 = vmul.f32 %v2400_v49, %v964_v24 }
 0x866   :  { %992 = vrot.lane.b32.xlu1 %v986_v15, %s1872_s7  ;;  %1025 = vrot.lane.b32.xlu0 %v1019_v48, %s1842_s2  ;;  %v2421_v53 = vsel %vm1047_vm2, %v2389_v12, %v2387_v46  ;;  %v1052_v54 = vmul.f32 %v2389_v12, %v2385_v10  ;;  %v1021_v42 = vmul.f32 %v2377_v41, %v2395_v18 }
 0x867   :  { %v1719_v27 = vpop.permute.xlu1 %1718  ;;  %v1085_v51 = vmul.f32 %v2404_v23, %v2385_v10  ;;  %v2431_v55 = vsel %vm1080_vm3, %v2404_v23, %v2402_v21  ;;  %v1737_v58 = vpack.i.bf16 %v988_v52, %v987_v56  ;;  %v1053_v59 = vmul.f32 %v2421_v53, %v964_v24 }
 0x868   :  { %v1724_v60 = vpop.permute.xlu0 %1723  ;;  %v1742_v62 = vpack.i.bf16 %v1021_v42, %v1020_v7  ;;  %v1054_v63 = vmul.f32 %v2387_v46, %v2395_v18  ;;  %v1086_v0 = vmul.f32 %v2431_v55, %v964_v24  ;;  %v1087_v2 = vmul.f32 %v2402_v21, %v2395_v18 }
 0x869   :  { %v2442_v5 = vunpack.i.h.bf16 %v1719_v27  ;;  %v2444_v6 = vunpack.i.l.bf16 %v1719_v27  ;;  %v2452_v11 = vunpack.i.l.bf16 %v1724_v60  ;;  %v2459_v17 = vunpack.i.h.bf16 %v1724_v60 }
 0x86a   :  { %1058 = vrot.lane.b32.xlu1 %v1052_v54, %s1871_s27  ;;  %1091 = vrot.lane.b32.xlu0 %v1085_v51, %s1870_s9  ;;  %v1747_v13 = vpack.i.bf16 %v1054_v63, %v1053_v59  ;;  %v1752_v14 = vpack.i.bf16 %v1087_v2, %v1086_v0 }
 0x86b   :  { %v1729_v57 = vpop.permute.xlu1 %1728  ;;  %v2457_v16 = vsel %vm1097_vm4, %v2444_v6, %v2442_v5  ;;  %v1150_v22 = vmul.f32 %v2452_v11, %v2385_v10  ;;  %v1119_v25 = vmul.f32 %v2444_v6, %v2385_v10  ;;  %v1121_v28 = vmul.f32 %v2442_v5, %v2395_v18 }
 0x86c   :  { %v2446_v8 = vunpack.i.h.bf16 %v1729_v57  ;;  %v2448_v9 = vunpack.i.l.bf16 %v1729_v57  ;;  %v1734_v20 = vpop.permute.xlu0 %1733  ;;  %v1120_v26 = vmul.f32 %v2457_v16, %v964_v24  ;;  %v2481_v32 = vsel %vm1064_vm7, %v2452_v11, %v2459_v17 }
 0x86d   :  { %v2483_v33 = vunpack.i.h.bf16 %v1734_v20  ;;  %v2485_v34 = vunpack.i.l.bf16 %v1734_v20  ;;  %v1151_v37 = vmul.f32 %v2481_v32, %v964_v24  ;;  %v1152_v38 = vmul.f32 %v2459_v17, %v2395_v18 }
 0x86e   :  { %1738 = vrot.lane.b32.xlu1 %v1737_v58, %s1872_s7  ;;  %1743 = vrot.lane.b32.xlu0 %v1742_v62, %s1842_s2  ;;  %v2464_v19 = vsel %vm1031_vm5, %v2448_v9, %v2446_v8  ;;  %v1183_v31 = vmul.f32 %v2446_v8, %v2395_v18  ;;  %v1757_v35 = vpack.i.bf16 %v1121_v28, %v1120_v26 }
 0x86f   :  { %v1182_v29 = vmul.f32 %v2464_v19, %v964_v24  ;;  %v2495_v39 = vsel %vm998_vm8, %v2485_v34, %v2483_v33  ;;  %v1762_v3 = vpack.i.bf16 %v1152_v38, %v1151_v37  ;;  %v1181_v40 = vmul.f32 %v2448_v9, %v2385_v10 }
 0x870   :  { %v1213_v45 = vmul.f32 %v2495_v39, %v964_v24  ;;  %v1214_v47 = vmul.f32 %v2483_v33, %v2395_v18  ;;  %v1212_v48 = vmul.f32 %v2485_v34, %v2385_v10 }
 0x871   :  { %v1767_v36 = vpack.i.bf16 %v1183_v31, %v1182_v29 }
 0x872   :  { %1748 = vrot.lane.b32.xlu1 %v1747_v13, %s1871_s27  ;;  %1753 = vrot.lane.b32.xlu0 %v1752_v14, %s1870_s9  ;;  %v1772_v15 = vpack.i.bf16 %v1214_v47, %v1213_v45 }
 0x876   :  { %1156 = vrot.lane.b32.xlu1 %v1150_v22, %s1868_s14  ;;  %1125 = vrot.lane.b32.xlu0 %v1119_v25, %s1869_s1 }
 0x87a   :  { %1758 = vrot.lane.b32.xlu1 %v1757_v35, %s1869_s1  ;;  %1768 = vrot.lane.b32.xlu0 %v1767_v36, %s1847_s28 }
 0x87e   :  { %1763 = vrot.lane.b32.xlu1 %v1762_v3, %s1868_s14  ;;  %1187 = vrot.lane.b32.xlu0 %v1181_v40, %s1847_s28 }
 0x882   :  { %1773 = vrot.lane.b32.xlu1 %v1772_v15, %s1867_s8  ;;  %1218 = vrot.lane.b32.xlu0 %v1212_v48, %s1867_s8 }
 0x8d8   :  { %v993_v27 = vpop.permute.xlu1 %992  ;;  %v1026_v51 = vpop.permute.xlu0 %1025 }
 0x8dc   :  { %v1059_v52 = vpop.permute.xlu1 %1058  ;;  %v1092_v54 = vpop.permute.xlu0 %1091 }
 0x8e0   :  { %v1739_v24 = vpop.permute.xlu1 %1738  ;;  %v1744_v7 = vpop.permute.xlu0 %1743 }
 0x8e1   :  { %v1741_v42 = vunpack.i.h.bf16 %v1739_v24  ;;  %v1740_v18 = vunpack.i.l.bf16 %v1739_v24  ;;  %v1746_v56 = vunpack.i.h.bf16 %v1744_v7  ;;  %v1745_v57 = vunpack.i.l.bf16 %v1744_v7 }
 0x8e3   :  { %v999_v58 = vsel %vm998_vm8, %v993_v27, %v1740_v18  ;;  %v1032_v59 = vsel %vm1031_vm5, %v1026_v51, %v1745_v57  ;;  %v1000_v10 = vsel %vm998_vm8, %v1740_v18, %v1741_v42  ;;  %v1033_v60 = vsel %vm1031_vm5, %v1745_v57, %v1746_v56 }
 0x8e4   :  { %v1250_v62 = vpack.c.bf16 %v1032_v59, %v999_v58  ;;  %v1749_v63 = vpop.permute.xlu1 %1748  ;;  %v1754_v0 = vpop.permute.xlu0 %1753  ;;  %v1251_v2 = vpack.c.bf16 %v1033_v60, %v1000_v10 }
 0x8e5   :  { %v1751_v13 = vunpack.i.h.bf16 %v1749_v63  ;;  %v1750_v14 = vunpack.i.l.bf16 %v1749_v63  ;;  %v1756_v20 = vunpack.i.h.bf16 %v1754_v0  ;;  %v1755_v22 = vunpack.i.l.bf16 %v1754_v0 }
 0x8e6   :  { %1264 = vmatprep.subr.bf16.mxu1 %v1251_v2 }
 0x8e7   :  { %v1065_v25 = vsel %vm1064_vm7, %v1059_v52, %v1750_v14  ;;  %v1098_v26 = vsel %vm1097_vm4, %v1092_v54, %v1755_v22  ;;  %1265 = vmatpush1.bf16.msra.mxu1 %v1250_v62  ;;  %v1066_v28 = vsel %vm1064_vm7, %v1750_v14, %v1751_v13  ;;  %v1099_v29 = vsel %vm1097_vm4, %v1755_v22, %v1756_v20  ;;  %v1260_v14 = vld [vmem:[%s2632_s11] sm:$0xf] }
 0x8e8   :  { %v1252_v31 = vpack.c.bf16 %v1098_v26, %v1065_v25  ;;  %v1157_v35 = vpop.permute.xlu1 %1156  ;;  %v1126_v36 = vpop.permute.xlu0 %1125  ;;  %v1253_v37 = vpack.c.bf16 %v1099_v29, %v1066_v28 }
 0x8ea   :  { %1266 = vmatprep.subr.bf16.mxu1 %v1253_v37 }
 0x8eb   :  { %1267 = vmatpush1.bf16.msra.mxu1 %v1252_v31 }
 0x8ec   :  { %v1759_v38 = vpop.permute.xlu1 %1758  ;;  %v1769_v3 = vpop.permute.xlu0 %1768 }
 0x8ed   :  { %v1761_v40 = vunpack.i.h.bf16 %v1759_v38  ;;  %v1760_v45 = vunpack.i.l.bf16 %v1759_v38  ;;  %v1771_v15 = vunpack.i.h.bf16 %v1769_v3  ;;  %v1770_v48 = vunpack.i.l.bf16 %v1769_v3 }
 0x8ef   :  { %v1131_v47 = vsel %vm1080_vm3, %v1126_v36, %v1760_v45  ;;  %v1132_v27 = vsel %vm1080_vm3, %v1760_v45, %v1761_v40  ;;  %v1194_v58 = vsel %vm1014_vm0, %v1770_v48, %v1771_v15 }
 0x8f0   :  { %v1254_v51 = vpack.c.bf16 %v1131_v47, %v2301_v61  ;;  %v1764_v52 = vpop.permute.xlu1 %1763  ;;  %v1188_v54 = vpop.permute.xlu0 %1187  ;;  %v1255_v24 = vpack.c.bf16 %v1132_v27, %v2313_v1 }
 0x8f1   :  { %v1766_v7 = vunpack.i.h.bf16 %v1764_v52  ;;  %v1765_v42 = vunpack.i.l.bf16 %v1764_v52  ;;  %v1193_v56 = vsel %vm1014_vm0, %v1188_v54, %v1770_v48 }
 0x8f2   :  { %1268 = vmatprep.subr.bf16.mxu1 %v1255_v24 }
 0x8f3   :  { %v1162_v18 = vsel %vm1047_vm2, %v1157_v35, %v1765_v42  ;;  %1269 = vmatpush1.bf16.msra.mxu1 %v1254_v51  ;;  %v1163_v57 = vsel %vm1047_vm2, %v1765_v42, %v1766_v7 }
 0x8f4   :  { %v1256_v59 = vpack.c.bf16 %v1193_v56, %v1162_v18  ;;  %v1774_v10 = vpop.permute.xlu1 %1773  ;;  %v1257_v60 = vpack.c.bf16 %v1194_v58, %v1163_v57  ;;  %v1219_v63 = vpop.permute.xlu0 %1218 }
 0x8f5   :  { %v1776_v61 = vunpack.i.h.bf16 %v1774_v10  ;;  %v1775_v62 = vunpack.i.l.bf16 %v1774_v10 }
 0x8f6   :  { %1270 = vmatprep.subr.bf16.mxu1 %v1257_v60 }
 0x8f7   :  { %v1224_v1 = vsel %vm981_vm1, %v1219_v63, %v1775_v62  ;;  %1271 = vmatpush1.bf16.msra.mxu1 %v1256_v59  ;;  %v1225_v0 = vsel %vm981_vm1, %v1775_v62, %v1776_v61 }
 0x8f8   :  { %v1258_v2 = vpack.c.bf16 %v1865_v30, %v1224_v1  ;;  %v1259_v13 = vpack.c.bf16 %v1865_v30, %v1225_v0 }
 0x8fa   :  { %1272 = vmatprep.subr.bf16.mxu1 %v1259_v13 }
 0x8fb   :  { %1273 = vmatpush1.bf16.msra.mxu1 %v1258_v2 }
 0x8fe   :  { %1618 = vmatmul.mubr.msk.bf16.vlgmr.msra.gmra.mrb[12].mxu1 %vm1031_vm5, %v1260_v14 }
 0x9d1   :  { %v2534_v20 = vpop.f32.mrb[12].mxu1 }
 0x9d2   :  { %v1305_v22 = vmax.f32 %v2534_v20, 0.0  ;;  %v2537_v25 = vpop.f32.mrb[13].mxu1 }
 0x9d3   :  { %v1306_v26 = vmax.f32 %v2537_v25, 0.0  ;;  %v1302_v28 = vpop.f32.mrb[14].mxu1 }
 0x9d4   :  { %1309 = vrot.lane.b32.xlu1 %v1305_v22, %s1844_s4  ;;  %v1303_v29 = vpop.f32.mrb[15].mxu1 }
 0x9d5   :  { %1311 = vrot.lane.b32.xlu0 %v1306_v26, %s1844_s4 }
 0xa46   :  { %v1310_v31 = vpop.permute.xlu1 %1309 }
 0xa47   :  { %1317 = vst.msk [vmem:[#allocation5] sm:$0xff] %vm968_vm15, %v1310_v31  ;;  %v1312_v35 = vpop.permute.xlu0 %1311 }
 0xa48   :  { %v1313_v36 = vsel %vm269_vm6, %v1310_v31, %v1312_v35  ;;  %1319 = vst.msk [vmem:[#allocation5 + $0x10] sm:$0xff] %vm269_vm6, %v1312_v35 }
 0xa4e   :  { %v1320_v37 = vld [vmem:[#allocation5] sm:$0xff] }
 0xa4f   :  { %v1323_v38 = vmul.f32 %v2383_v4, %v1320_v37  ;;  %v1344_v3 = vmul.f32 %v2379_v43, %v1320_v37  ;;  %v1343_v40 = vld [vmem:[#allocation5 + $0x10] sm:$0xff]  ;;  %v1365_v45 = vmul.f32 %v2389_v12, %v1320_v37  ;;  %v1386_v47 = vmul.f32 %v2404_v23, %v1320_v37 }
 0xa50   :  { %v1346_v15 = vmul.f32 %v2377_v41, %v1343_v40  ;;  %v1325_v48 = vmul.f32 %v2381_v44, %v1343_v40  ;;  %v1345_v4 = vmul.f32 %v1313_v36, %v2400_v49  ;;  %v1324_v43 = vmul.f32 %v1313_v36, %v2409_v50 }
 0xa51   :  { %1329 = vrot.lane.b32.xlu1 %v1323_v38, %s1872_s7  ;;  %1350 = vrot.lane.b32.xlu0 %v1344_v3, %s1842_s2  ;;  %v1388_v52 = vmul.f32 %v2402_v21, %v1343_v40  ;;  %v1367_v12 = vmul.f32 %v2387_v46, %v1343_v40  ;;  %v1387_v41 = vmul.f32 %v1313_v36, %v2431_v55 }
 0xa52   :  { %v1782_v27 = vpack.i.bf16 %v1346_v15, %v1345_v4  ;;  %v1777_v51 = vpack.i.bf16 %v1325_v48, %v1324_v43  ;;  %v1366_v44 = vmul.f32 %v1313_v36, %v2421_v53  ;;  %v1409_v49 = vmul.f32 %v2444_v6, %v1320_v37 }
 0xa53   :  { %v1792_v23 = vpack.i.bf16 %v1388_v52, %v1387_v41  ;;  %v1430_v21 = vmul.f32 %v2452_v11, %v1320_v37  ;;  %v1453_v46 = vmul.f32 %v2446_v8, %v1343_v40  ;;  %v1411_v50 = vmul.f32 %v2442_v5, %v1343_v40 }
 0xa54   :  { %v1787_v54 = vpack.i.bf16 %v1367_v12, %v1366_v44  ;;  %v1452_v53 = vmul.f32 %v1313_v36, %v2464_v19  ;;  %v1410_v55 = vmul.f32 %v1313_v36, %v2457_v16  ;;  %v1432_v42 = vmul.f32 %v2459_v17, %v1343_v40 }
 0xa55   :  { %1371 = vrot.lane.b32.xlu1 %v1365_v45, %s1871_s27  ;;  %1392 = vrot.lane.b32.xlu0 %v1386_v47, %s1870_s9  ;;  %v1431_v6 = vmul.f32 %v1313_v36, %v2481_v32  ;;  %v1451_v5 = vmul.f32 %v2448_v9, %v1320_v37  ;;  %v1474_v11 = vmul.f32 %v2483_v33, %v1343_v40 }
 0xa56   :  { %v1807_v24 = vpack.i.bf16 %v1453_v46, %v1452_v53  ;;  %v1797_v7 = vpack.i.bf16 %v1411_v50, %v1410_v55  ;;  %v1473_v16 = vmul.f32 %v1313_v36, %v2495_v39  ;;  %v1472_v19 = vmul.f32 %v2485_v34, %v1320_v37 }
 0xa57   :  { %v1802_v8 = vpack.i.bf16 %v1432_v42, %v1431_v6 }
 0xa58   :  { %v1812_v17 = vpack.i.bf16 %v1474_v11, %v1473_v16 }
 0xa59   :  { %1783 = vrot.lane.b32.xlu0 %v1782_v27, %s1842_s2  ;;  %1778 = vrot.lane.b32.xlu1 %v1777_v51, %s1872_s7 }
 0xa5d   :  { %1793 = vrot.lane.b32.xlu0 %v1792_v23, %s1870_s9  ;;  %1788 = vrot.lane.b32.xlu1 %v1787_v54, %s1871_s27 }
 0xa61   :  { %1415 = vrot.lane.b32.xlu0 %v1409_v49, %s1869_s1  ;;  %1436 = vrot.lane.b32.xlu1 %v1430_v21, %s1868_s14 }
 0xa65   :  { %1808 = vrot.lane.b32.xlu0 %v1807_v24, %s1847_s28  ;;  %1798 = vrot.lane.b32.xlu1 %v1797_v7, %s1869_s1 }
 0xa69   :  { %1457 = vrot.lane.b32.xlu0 %v1451_v5, %s1847_s28  ;;  %1803 = vrot.lane.b32.xlu1 %v1802_v8, %s1868_s14  ;;  %v1520_v8 = vld [vmem:[%s2633_s12] sm:$0xf] }
 0xa6d   :  { %1478 = vrot.lane.b32.xlu0 %v1472_v19, %s1867_s8  ;;  %1813 = vrot.lane.b32.xlu1 %v1812_v17, %s1867_s8 }
 0xac3   :  { %v1330_v18 = vpop.permute.xlu1 %1329  ;;  %v1351_v32 = vpop.permute.xlu0 %1350 }
 0xac7   :  { %v1372_v56 = vpop.permute.xlu1 %1371  ;;  %v1393_v9 = vpop.permute.xlu0 %1392 }
 0xacb   :  { %v1779_v57 = vpop.permute.xlu1 %1778  ;;  %v1784_v58 = vpop.permute.xlu0 %1783 }
 0xacc   :  { %v1781_v33 = vunpack.i.h.bf16 %v1779_v57  ;;  %v1780_v59 = vunpack.i.l.bf16 %v1779_v57  ;;  %v1786_v10 = vunpack.i.h.bf16 %v1784_v58  ;;  %v1785_v60 = vunpack.i.l.bf16 %v1784_v58 }
 0xace   :  { %v1335_v61 = vsel %vm998_vm8, %v1330_v18, %v1780_v59  ;;  %v1356_v39 = vsel %vm1031_vm5, %v1351_v32, %v1785_v60  ;;  %v1336_v34 = vsel %vm998_vm8, %v1780_v59, %v1781_v33  ;;  %v1357_v62 = vsel %vm1031_vm5, %v1785_v60, %v1786_v10 }
 0xacf   :  { %v1510_v63 = vpack.c.bf16 %v1356_v39, %v1335_v61  ;;  %v1789_v1 = vpop.permute.xlu1 %1788  ;;  %v1794_v0 = vpop.permute.xlu0 %1793  ;;  %v1511_v2 = vpack.c.bf16 %v1357_v62, %v1336_v34 }
 0xad0   :  { %v1791_v13 = vunpack.i.h.bf16 %v1789_v1  ;;  %v1790_v14 = vunpack.i.l.bf16 %v1789_v1  ;;  %v1796_v28 = vunpack.i.h.bf16 %v1794_v0  ;;  %v1795_v29 = vunpack.i.l.bf16 %v1794_v0 }
 0xad1   :  { %1524 = vmatprep.subr.bf16.mxu0 %v1511_v2 }
 0xad2   :  { %v1377_v31 = vsel %vm1064_vm7, %v1372_v56, %v1790_v14  ;;  %v1398_v35 = vsel %vm1097_vm4, %v1393_v9, %v1795_v29  ;;  %1525 = vmatpush1.bf16.msra.mxu0 %v1510_v63  ;;  %v1378_v36 = vsel %vm1064_vm7, %v1790_v14, %v1791_v13  ;;  %v1399_v37 = vsel %vm1097_vm4, %v1795_v29, %v1796_v28 }
 0xad3   :  { %v1512_v38 = vpack.c.bf16 %v1398_v35, %v1377_v31  ;;  %v1437_v3 = vpop.permute.xlu1 %1436  ;;  %v1416_v40 = vpop.permute.xlu0 %1415  ;;  %v1513_v45 = vpack.c.bf16 %v1399_v37, %v1378_v36 }
 0xad5   :  { %1526 = vmatprep.subr.bf16.mxu0 %v1513_v45 }
 0xad6   :  { %1527 = vmatpush1.bf16.msra.mxu0 %v1512_v38 }
 0xad7   :  { %v1799_v47 = vpop.permute.xlu1 %1798  ;;  %v1809_v15 = vpop.permute.xlu0 %1808 }
 0xad8   :  { %v1801_v48 = vunpack.i.h.bf16 %v1799_v47  ;;  %v1800_v4 = vunpack.i.l.bf16 %v1799_v47  ;;  %v1811_v27 = vunpack.i.h.bf16 %v1809_v15  ;;  %v1810_v51 = vunpack.i.l.bf16 %v1809_v15 }
 0xada   :  { %v1421_v43 = vsel %vm1080_vm3, %v1416_v40, %v1800_v4  ;;  %v1422_v52 = vsel %vm1080_vm3, %v1800_v4, %v1801_v48  ;;  %v1464_v53 = vsel %vm1014_vm0, %v1810_v51, %v1811_v27 }
 0xadb   :  { %v1514_v12 = vpack.c.bf16 %v1421_v43, %v1305_v22  ;;  %v1804_v41 = vpop.permute.xlu1 %1803  ;;  %v1458_v44 = vpop.permute.xlu0 %1457  ;;  %v1515_v23 = vpack.c.bf16 %v1422_v52, %v1306_v26 }
 0xadc   :  { %v1806_v54 = vunpack.i.h.bf16 %v1804_v41  ;;  %v1805_v49 = vunpack.i.l.bf16 %v1804_v41  ;;  %v1463_v46 = vsel %vm1014_vm0, %v1458_v44, %v1810_v51 }
 0xadd   :  { %1528 = vmatprep.subr.bf16.mxu0 %v1515_v23 }
 0xade   :  { %v1442_v21 = vsel %vm1047_vm2, %v1437_v3, %v1805_v49  ;;  %1529 = vmatpush1.bf16.msra.mxu0 %v1514_v12  ;;  %v1443_v50 = vsel %vm1047_vm2, %v1805_v49, %v1806_v54 }
 0xadf   :  { %v1516_v55 = vpack.c.bf16 %v1463_v46, %v1442_v21  ;;  %v1814_v20 = vpop.permute.xlu1 %1813  ;;  %v1517_v22 = vpack.c.bf16 %v1464_v53, %v1443_v50  ;;  %v1479_v42 = vpop.permute.xlu0 %1478 }
 0xae0   :  { %v1816_v24 = vunpack.i.h.bf16 %v1814_v20  ;;  %v1815_v7 = vunpack.i.l.bf16 %v1814_v20 }
 0xae1   :  { %1530 = vmatprep.subr.bf16.mxu0 %v1517_v22 }
 0xae2   :  { %v1484_v25 = vsel %vm981_vm1, %v1479_v42, %v1815_v7  ;;  %1531 = vmatpush1.bf16.msra.mxu0 %v1516_v55  ;;  %v1485_v26 = vsel %vm981_vm1, %v1815_v7, %v1816_v24 }
 0xae3   :  { %v1518_v6 = vpack.c.bf16 %v1865_v30, %v1484_v25  ;;  %v1519_v5 = vpack.c.bf16 %v1865_v30, %v1485_v26 }
 0xae5   :  { %1532 = vmatprep.subr.bf16.mxu0 %v1519_v5 }
 0xae6   :  { %1533 = vmatpush1.bf16.msra.mxu0 %v1518_v6 }
 0xae9   :  { %1619 = vmatmul.mubr.msk.bf16.vlgmr.msra.gmra.mrb[8].mxu0 %vm1031_vm5, %v1520_v8 }
 0xbbc   :  { %v1558_v11 = vpop.f32.mrb[8].mxu0 }
 0xbbd   :  { %1835 = vtanh.f32 %v1558_v11  ;;  %v1560_v16 = vpop.f32.mrb[9].mxu0 }
 0xbbe   :  { %1837 = vtanh.f32 %v1560_v16  ;;  %v1562_v19 = vpop.f32.mrb[10].mxu0 }
 0xbbf   :  { %v1563_v17 = vpop.f32.mrb[11].mxu0 }
 0xbc7   :  { %v1836_v18 = vpop.eup %1835 }
 0xbc8   :  { %v1838_v32 = vpop.eup %1837  ;;  %1567 = vst [vmem:[%s2634_s13] sm:$0xff] %v1836_v18 }
 0xbc9   :  { %1568 = vst [vmem:[%s2634_s13 + $0x8] sm:$0xff] %v1838_v32 }

</bundles_post_ra>
